<compile_context>
chip_gen: v5e
topology: v5e:2x2
jax: 0.10.0
libtpu: 0.0.40
codegen_flags: <defaults>
</compile_context>

<pallas_src>
import functools

import jax
import jax.numpy as jnp
from jax.experimental import pallas as pl
from jax.experimental.pallas import tpu as pltpu


# ----------------------------------------------------------------------------
# Fused MBConv kernel (one image per grid step; activations never leave VMEM)
# ----------------------------------------------------------------------------

def _mbconv_kernel(x_ref, w1_ref, b1_ref, wdw_ref, b2_ref, mask_ref,
                   wse1_ref, bse1_ref, wse2_ref, bse2_ref, w3_ref, b3_ref,
                   o_ref, *, K, W, HW):
    """1x1+BN+ReLU6 -> depthwise KxK+BN+ReLU6 -> SE -> 1x1+BN -> +residual, fused.

    All per-image activations are (C, H*W) 2-D tiles: channels on sublanes,
    flattened spatial on lanes (lane-dense for H*W >= 128).
    """
    r = K // 2

    # -- 1x1 expand conv (BN pre-folded; bf16 MXU operands, f32 accumulation) + ReLU6
    out1 = jnp.dot(w1_ref[...], x_ref[...], preferred_element_type=jnp.float32)
    out1 = jnp.clip(out1 + b1_ref[...], 0.0, 6.0)               # (Cmid, HW) f32
    # dropout(p=0) -> identity

    # -- depthwise KxK, stride=1, pad=K//2 (BN pre-folded) + ReLU6 ------------
    # Each tap is an XLU lane rotation of the VMEM-resident activation along the
    # flattened spatial axis; a host-precomputed full (row AND column) validity
    # mask zeroes the wrapped positions.  No padded scratch, no misaligned slices.
    wdw = wdw_ref[...]                                          # (Cmid, K*K), one load
    acc = None
    for kh in range(K):
        for kw in range(K):
            t = kh * K + kw
            off = (kh - r) * W + (kw - r)                       # flat spatial offset
            tap = out1 if off == 0 else pltpu.roll(out1, (-off) % HW, 1)
            if off != 0:                                        # center tap: no mask
                tap = tap * mask_ref[t]                         # (1, HW) sublane-bcast
            contrib = tap * wdw[:, t:t + 1]                     # (Cmid, 1) lane-bcast
            acc = contrib if acc is None else acc + contrib     # init with first tap
    out2 = jnp.clip(acc + b2_ref[...], 0.0, 6.0)                # (Cmid, HW) f32
    # dropout(p=0) -> identity

    # -- Squeeze-and-Excitation (tiny FCs as VPU FMAs + XLU reductions, no MXU)
    s = jnp.mean(out2, axis=1, keepdims=True)                   # (Cmid, 1) squeeze
    h = jnp.sum(wse1_ref[...] * s, axis=0, keepdims=True) + bse1_ref[...]   # (1, Cr)
    h = jnp.maximum(h, 0.0)                                     # ReLU
    g = jnp.sum(wse2_ref[...] * h, axis=1, keepdims=True) + bse2_ref[...]   # (Cmid, 1)
    g = jax.nn.sigmoid(g)
    gated = (out2 * g).astype(w3_ref.dtype)                     # excite; bf16 MXU operand

    # -- 1x1 project conv (BN pre-folded) + residual add ----------------------
    y = jnp.dot(w3_ref[...], gated, preferred_element_type=jnp.float32)     # (Cout, HW)
    # Residual re-read from the VMEM ref here (not held live across the kernel).
    o_ref[...] = (y + b3_ref[...] + x_ref[...].astype(jnp.float32)).astype(o_ref.dtype)


# ----------------------------------------------------------------------------
# Wrapper (NCHW in / NCHW out — no layout transposes needed for PyTorch parity)
# ----------------------------------------------------------------------------

@functools.partial(jax.jit, static_argnames=("kernel_size", "vmem_limit_mb"))
def mbconv_forward(x_nchw, params, *, kernel_size=3, vmem_limit_mb=48):
    B, Cin, H, W = x_nchw.shape
    HW = H * W
    K = kernel_size
    Cmid = params["w1"].shape[0]
    Cout = params["w3"].shape[0]
    Cr = params["w_se1"].shape[1]
    # Residual path of this stride=1 block requires matching channel counts.
    assert Cin == Cout, "stride=1 MBConv residual requires Cin == Cout"

    # Host-precomputed FULL validity masks (row AND column edges) over the
    # flattened spatial axis, one per depthwise tap.
    r = K // 2
    p = jnp.arange(HW, dtype=jnp.int32)
    row, col = p // W, p % W
    masks = []
    for kh in range(K):
        for kw in range(K):
            dh, dw = kh - r, kw - r
            masks.append((row + dh >= 0) & (row + dh < H) &
                         (col + dw >= 0) & (col + dw < W))
    dw_mask = jnp.stack(masks).astype(jnp.float32).reshape(K * K, 1, HW)

    # bf16 activation I/O (f32 math inside) halves the block's HBM traffic.
    x_flat = x_nchw.reshape(B * Cin, HW).astype(jnp.bfloat16)

    kern = functools.partial(_mbconv_kernel, K=K, W=W, HW=HW)

    def inv(shape):  # grid-invariant (weight / mask) spec
        return pl.BlockSpec(shape, lambda b: (0,) * len(shape))
    # TODO(synk): pipeline_mode=pl.Buffered(1) on these invariant specs would reclaim
    # the duplicate VMEM buffer (matters at Cmid >= 480).

    y_flat = pl.pallas_call(
        kern,
        out_shape=jax.ShapeDtypeStruct((B * Cout, HW), jnp.bfloat16),
        grid=(B,),
        in_specs=[
            pl.BlockSpec((Cin, HW), lambda b: (b, 0)),   # x, one image per step
            inv((Cmid, Cin)),                            # w1 (BN folded, bf16)
            inv((Cmid, 1)),                              # b1
            inv((Cmid, K * K)),                          # depthwise w (BN folded)
            inv((Cmid, 1)),                              # b2
            inv((K * K, 1, HW)),                         # per-tap validity masks
            inv((Cmid, Cr)),                             # SE fc1 weight (transposed)
            inv((1, Cr)),                                # SE fc1 bias
            inv((Cmid, Cr)),                             # SE fc2 weight
            inv((Cmid, 1)),                              # SE fc2 bias
            inv((Cout, Cmid)),                           # w3 (BN folded, bf16)
            inv((Cout, 1)),                              # b3
        ],
        out_specs=pl.BlockSpec((Cout, HW), lambda b: (b, 0)),
        compiler_params=pltpu.CompilerParams(
            dimension_semantics=("parallel",),           # batch -> both v7x TCs
            vmem_limit_bytes=vmem_limit_mb * 1024 * 1024,
        ),
    )(x_flat, params["w1"], params["b1"], params["w_dw"], params["b2"], dw_mask,
      params["w_se1"], params["b_se1"], params["w_se2"], params["b_se2"],
      params["w3"], params["b3"])

    return y_flat.reshape(B, Cout, H, W)


# ----------------------------------------------------------------------------
# Parameters: synthetic PyTorch-layout params + host-side BN folding
# ----------------------------------------------------------------------------

def _bn_fold(bn, eps=1e-5):
    scale = bn["gamma"] / jnp.sqrt(bn["var"] + eps)
    bias = bn["beta"] - bn["mean"] * scale
    return scale, bias


def init_raw_params(key, inplanes, outplanes, expansion, kernel_size, reduction=8):
    """Synthetic parameters in PyTorch layouts (conv weights, BN stats, SE FCs)."""
    Cmid = inplanes * expansion
    Cr = Cmid // reduction
    ks = jax.random.split(key, 12)
    raw = dict(
        conv1_w=0.1 * jax.random.normal(ks[0], (Cmid, inplanes), jnp.float32),   # conv1.weight[:,:,0,0]
        convdw_w=0.1 * jax.random.normal(ks[1], (Cmid, kernel_size, kernel_size),
                                         jnp.float32),                           # conv_dw.weight[:,0]
        conv3_w=0.1 * jax.random.normal(ks[2], (outplanes, Cmid), jnp.float32),  # conv3.weight[:,:,0,0]
        se_fc1_w=0.1 * jax.random.normal(ks[3], (Cr, Cmid), jnp.float32),        # fc1.weight
        se_fc1_b=0.1 * jax.random.normal(ks[4], (Cr,), jnp.float32),
        se_fc2_w=0.1 * jax.random.normal(ks[5], (Cmid, Cr), jnp.float32),        # fc2.weight
        se_fc2_b=0.1 * jax.random.normal(ks[6], (Cmid,), jnp.float32),
    )
    for i, (name, C) in enumerate((("bn1", Cmid), ("bn2", Cmid), ("bn3", outplanes))):
        kg, kb, km, kv = jax.random.split(ks[7 + i], 4)
        raw[name] = dict(
            gamma=jax.random.uniform(kg, (C,), jnp.float32, 0.5, 1.5),
            beta=0.1 * jax.random.normal(kb, (C,), jnp.float32),
            mean=0.1 * jax.random.normal(km, (C,), jnp.float32),
            var=jax.random.uniform(kv, (C,), jnp.float32, 0.5, 1.5),
        )
    return raw


def fold_params(raw, kernel_size):
    """Fold eval-mode BatchNorm into the conv weights and lay everything out for the
    channels-on-sublanes (C, H*W) fused kernel.  MXU weights are bf16."""
    K = kernel_size
    s1, b1 = _bn_fold(raw["bn1"])
    s2, b2 = _bn_fold(raw["bn2"])
    s3, b3 = _bn_fold(raw["bn3"])
    Cmid = raw["conv1_w"].shape[0]
    wdw = (raw["convdw_w"] * s2[:, None, None]).reshape(Cmid, K * K)   # (Cmid, K*K)
    return dict(
        w1=(raw["conv1_w"] * s1[:, None]).astype(jnp.bfloat16),        # (Cmid, Cin)
        b1=b1[:, None],                                                # (Cmid, 1)
        w_dw=wdw,                                                      # (Cmid, K*K) f32
        b2=b2[:, None],                                                # (Cmid, 1)
        w_se1=raw["se_fc1_w"].T,                                       # (Cmid, Cr)
        b_se1=raw["se_fc1_b"][None, :],                                # (1, Cr)
        w_se2=raw["se_fc2_w"],                                         # (Cmid, Cr)
        b_se2=raw["se_fc2_b"][:, None],                                # (Cmid, 1)
        w3=(raw["conv3_w"] * s3[:, None]).astype(jnp.bfloat16),        # (Cout, Cmid)
        b3=b3[:, None],                                                # (Cout, 1)
    )


# ----------------------------------------------------------------------------
# Pure-JAX reference (NCHW, f32) for a correctness check
# ----------------------------------------------------------------------------

def mbconv_reference(x_nchw, raw, *, kernel_size):
    B, Cin, H, W = x_nchw.shape
    K = kernel_size
    r = K // 2
    hp = jax.lax.Precision.HIGHEST
    s1, b1 = _bn_fold(raw["bn1"])
    s2, b2 = _bn_fold(raw["bn2"])
    s3, b3 = _bn_fold(raw["bn3"])
    out = jnp.einsum("oc,bchw->bohw", raw["conv1_w"], x_nchw, precision=hp)
    out = jnp.clip(out * s1[None, :, None, None] + b1[None, :, None, None], 0.0, 6.0)
    xp = jnp.pad(out, ((0, 0), (0, 0), (r, r), (r, r)))
    acc = jnp.zeros_like(out)
    for kh in range(K):
        for kw in range(K):
            acc = acc + (xp[:, :, kh:kh + H, kw:kw + W] *
                         raw["convdw_w"][None, :, kh, kw, None, None])
    out = jnp.clip(acc * s2[None, :, None, None] + b2[None, :, None, None], 0.0, 6.0)
    s = out.mean(axis=(2, 3))                                              # (B, Cmid)
    h = jax.nn.relu(s @ raw["se_fc1_w"].T + raw["se_fc1_b"])
    g = jax.nn.sigmoid(h @ raw["se_fc2_w"].T + raw["se_fc2_b"])
    out = out * g[:, :, None, None]
    y = jnp.einsum("oc,bchw->bohw", raw["conv3_w"], out, precision=hp)
    return y * s3[None, :, None, None] + b3[None, :, None, None] + x_nchw


# ----------------------------------------------------------------------------
# Main
# ----------------------------------------------------------------------------

if __name__ == "__main__":
    # One stride-1 SE block of an MnasNet stack (eval mode):
    # MBConv(inplanes=16, outplanes=16, expansion=2, kernel_size=3, stride=1, SE=True)
    B, Cin, H, W = 2, 16, 16, 16
    outplanes, expansion, kernel_size = 16, 2, 3

    key = jax.random.PRNGKey(0)
    kx, kp = jax.random.split(key)
    x = jax.random.normal(kx, (B, Cin, H, W), jnp.float32)       # NCHW, PyTorch convention

    raw = init_raw_params(kp, Cin, outplanes, expansion, kernel_size, reduction=8)
    params = fold_params(raw, kernel_size)

    y = mbconv_forward(x, params, kernel_size=kernel_size)
    y = jax.block_until_ready(y)

    assert y.shape == (B, outplanes, H, W), y.shape
    assert bool(jnp.all(jnp.isfinite(y.astype(jnp.float32))))

    # Numerical check against the pure-JAX f32 reference of the same block.
    # Tolerance loosened because the kernel uses bf16 activation I/O + bf16 MXU
    # operands (f32 accumulation / math inside).
    y_ref = mbconv_reference(x, raw, kernel_size=kernel_size)
    assert bool(jnp.allclose(y.astype(jnp.float32), y_ref, atol=5e-2, rtol=5e-2)), \
        float(jnp.max(jnp.abs(y.astype(jnp.float32) - y_ref)))

    print("KERNEL_OK")
</pallas_src>

<mosaic_0001>
module attributes {stable_mosaic.version = 11 : i64} {
  func.func @_mbconv_kernel(%arg0: i32, %arg1: memref<16x256xbf16, #tpu.memory_space<vmem>>, %arg2: memref<32x16xbf16, #tpu.memory_space<vmem>>, %arg3: memref<32x1xf32, #tpu.memory_space<vmem>>, %arg4: memref<32x9xf32, #tpu.memory_space<vmem>>, %arg5: memref<32x1xf32, #tpu.memory_space<vmem>>, %arg6: memref<9x1x256xf32, #tpu.memory_space<vmem>>, %arg7: memref<32x4xf32, #tpu.memory_space<vmem>>, %arg8: memref<1x4xf32, #tpu.memory_space<vmem>>, %arg9: memref<32x4xf32, #tpu.memory_space<vmem>>, %arg10: memref<32x1xf32, #tpu.memory_space<vmem>>, %arg11: memref<16x32xbf16, #tpu.memory_space<vmem>>, %arg12: memref<16x1xf32, #tpu.memory_space<vmem>>, %arg13: memref<16x256xbf16, #tpu.memory_space<vmem>>) attributes {dimension_semantics = [#tpu.dimension_semantics<parallel>], iteration_bounds = array<i64: 2>, scalar_prefetch = 0 : i64, scratch_operands = 0 : i64, tpu.core_type = #tpu.core_type<tc>, window_params = [{transform_indices = @transform_0, window_bounds = array<i64: 16, 256>}, {pipeline_mode = #tpu.pipeline_mode<synchronous>, transform_indices = @transform_1, window_bounds = array<i64: 32, 16>}, {pipeline_mode = #tpu.pipeline_mode<synchronous>, transform_indices = @transform_2, window_bounds = array<i64: 32, 1>}, {pipeline_mode = #tpu.pipeline_mode<synchronous>, transform_indices = @transform_3, window_bounds = array<i64: 32, 9>}, {pipeline_mode = #tpu.pipeline_mode<synchronous>, transform_indices = @transform_4, window_bounds = array<i64: 32, 1>}, {pipeline_mode = #tpu.pipeline_mode<synchronous>, transform_indices = @transform_5, window_bounds = array<i64: 9, 1, 256>}, {pipeline_mode = #tpu.pipeline_mode<synchronous>, transform_indices = @transform_6, window_bounds = array<i64: 32, 4>}, {pipeline_mode = #tpu.pipeline_mode<synchronous>, transform_indices = @transform_7, window_bounds = array<i64: 1, 4>}, {pipeline_mode = #tpu.pipeline_mode<synchronous>, transform_indices = @transform_8, window_bounds = array<i64: 32, 4>}, {pipeline_mode = #tpu.pipeline_mode<synchronous>, transform_indices = @transform_9, window_bounds = array<i64: 32, 1>}, {pipeline_mode = #tpu.pipeline_mode<synchronous>, transform_indices = @transform_10, window_bounds = array<i64: 16, 32>}, {pipeline_mode = #tpu.pipeline_mode<synchronous>, transform_indices = @transform_11, window_bounds = array<i64: 16, 1>}, {transform_indices = @transform_12, window_bounds = array<i64: 16, 256>}]} {
    %c0 = arith.constant 0 : index
    %c0_0 = arith.constant 0 : index
    %0 = vector.load %arg2[%c0, %c0_0] : memref<32x16xbf16, #tpu.memory_space<vmem>>, vector<32x16xbf16>
    %c0_1 = arith.constant 0 : index
    %c0_2 = arith.constant 0 : index
    %1 = vector.load %arg1[%c0_1, %c0_2] : memref<16x256xbf16, #tpu.memory_space<vmem>>, vector<16x256xbf16>
    %cst = arith.constant dense<0.000000e+00> : vector<32x256xf32>
    %2 = tpu.matmul %0, %1, %cst {dimension_numbers = #tpu.dot_dimension_numbers<[1], [0], [0], [1], [0, 0, 1, 1], [], []>} : vector<32x16xbf16>, vector<16x256xbf16>, vector<32x256xf32> -> vector<32x256xf32>
    %c0_3 = arith.constant 0 : index
    %c0_4 = arith.constant 0 : index
    %3 = vector.load %arg3[%c0_3, %c0_4] : memref<32x1xf32, #tpu.memory_space<vmem>>, vector<32x1xf32>
    %4 = vector.broadcast %3 : vector<32x1xf32> to vector<32x256xf32>
    %5 = arith.addf %2, %4 : vector<32x256xf32>
    %cst_5 = arith.constant 0.000000e+00 : f32
    %cst_6 = arith.constant 6.000000e+00 : f32
    %6 = vector.broadcast %cst_5 : f32 to vector<32x256xf32>
    %7 = arith.maximumf %6, %5 : vector<32x256xf32>
    %8 = vector.broadcast %cst_6 : f32 to vector<32x256xf32>
    %9 = arith.minimumf %8, %7 : vector<32x256xf32>
    %c0_7 = arith.constant 0 : index
    %c0_8 = arith.constant 0 : index
    %10 = vector.load %arg4[%c0_7, %c0_8] : memref<32x9xf32, #tpu.memory_space<vmem>>, vector<32x9xf32>
    %c17_i32 = arith.constant 17 : i32
    %11 = tpu.dynamic_rotate %9 by %c17_i32 dim 1 : vector<32x256xf32>, i32 -> vector<32x256xf32>
    %c0_9 = arith.constant 0 : index
    %c0_10 = arith.constant 0 : index
    %c0_11 = arith.constant 0 : index
    %12 = vector.load %arg6[%c0_9, %c0_10, %c0_11] : memref<9x1x256xf32, #tpu.memory_space<vmem>>, vector<1x1x256xf32>
    %13 = vector.shape_cast %12 : vector<1x1x256xf32> to vector<1x256xf32>
    %14 = vector.broadcast %13 : vector<1x256xf32> to vector<32x256xf32>
    %15 = arith.mulf %11, %14 : vector<32x256xf32>
    %16 = vector.extract_strided_slice %10 {offsets = [0, 0], sizes = [32, 1], strides = [1, 1]} : vector<32x9xf32> to vector<32x1xf32>
    %17 = vector.broadcast %16 : vector<32x1xf32> to vector<32x256xf32>
    %18 = arith.mulf %15, %17 : vector<32x256xf32>
    %c16_i32 = arith.constant 16 : i32
    %19 = tpu.dynamic_rotate %9 by %c16_i32 dim 1 : vector<32x256xf32>, i32 -> vector<32x256xf32>
    %c1 = arith.constant 1 : index
    %c0_12 = arith.constant 0 : index
    %c0_13 = arith.constant 0 : index
    %20 = vector.load %arg6[%c1, %c0_12, %c0_13] : memref<9x1x256xf32, #tpu.memory_space<vmem>>, vector<1x1x256xf32>
    %21 = vector.shape_cast %20 : vector<1x1x256xf32> to vector<1x256xf32>
    %22 = vector.broadcast %21 : vector<1x256xf32> to vector<32x256xf32>
    %23 = arith.mulf %19, %22 : vector<32x256xf32>
    %24 = vector.extract_strided_slice %10 {offsets = [0, 1], sizes = [32, 1], strides = [1, 1]} : vector<32x9xf32> to vector<32x1xf32>
    %25 = vector.broadcast %24 : vector<32x1xf32> to vector<32x256xf32>
    %26 = arith.mulf %23, %25 : vector<32x256xf32>
    %27 = arith.addf %18, %26 : vector<32x256xf32>
    %c15_i32 = arith.constant 15 : i32
    %28 = tpu.dynamic_rotate %9 by %c15_i32 dim 1 : vector<32x256xf32>, i32 -> vector<32x256xf32>
    %c2 = arith.constant 2 : index
    %c0_14 = arith.constant 0 : index
    %c0_15 = arith.constant 0 : index
    %29 = vector.load %arg6[%c2, %c0_14, %c0_15] : memref<9x1x256xf32, #tpu.memory_space<vmem>>, vector<1x1x256xf32>
    %30 = vector.shape_cast %29 : vector<1x1x256xf32> to vector<1x256xf32>
    %31 = vector.broadcast %30 : vector<1x256xf32> to vector<32x256xf32>
    %32 = arith.mulf %28, %31 : vector<32x256xf32>
    %33 = vector.extract_strided_slice %10 {offsets = [0, 2], sizes = [32, 1], strides = [1, 1]} : vector<32x9xf32> to vector<32x1xf32>
    %34 = vector.broadcast %33 : vector<32x1xf32> to vector<32x256xf32>
    %35 = arith.mulf %32, %34 : vector<32x256xf32>
    %36 = arith.addf %27, %35 : vector<32x256xf32>
    %c1_i32 = arith.constant 1 : i32
    %37 = tpu.dynamic_rotate %9 by %c1_i32 dim 1 : vector<32x256xf32>, i32 -> vector<32x256xf32>
    %c3 = arith.constant 3 : index
    %c0_16 = arith.constant 0 : index
    %c0_17 = arith.constant 0 : index
    %38 = vector.load %arg6[%c3, %c0_16, %c0_17] : memref<9x1x256xf32, #tpu.memory_space<vmem>>, vector<1x1x256xf32>
    %39 = vector.shape_cast %38 : vector<1x1x256xf32> to vector<1x256xf32>
    %40 = vector.broadcast %39 : vector<1x256xf32> to vector<32x256xf32>
    %41 = arith.mulf %37, %40 : vector<32x256xf32>
    %42 = vector.extract_strided_slice %10 {offsets = [0, 3], sizes = [32, 1], strides = [1, 1]} : vector<32x9xf32> to vector<32x1xf32>
    %43 = vector.broadcast %42 : vector<32x1xf32> to vector<32x256xf32>
    %44 = arith.mulf %41, %43 : vector<32x256xf32>
    %45 = arith.addf %36, %44 : vector<32x256xf32>
    %46 = vector.extract_strided_slice %10 {offsets = [0, 4], sizes = [32, 1], strides = [1, 1]} : vector<32x9xf32> to vector<32x1xf32>
    %47 = vector.broadcast %46 : vector<32x1xf32> to vector<32x256xf32>
    %48 = arith.mulf %9, %47 : vector<32x256xf32>
    %49 = arith.addf %45, %48 : vector<32x256xf32>
    %c255_i32 = arith.constant 255 : i32
    %50 = tpu.dynamic_rotate %9 by %c255_i32 dim 1 : vector<32x256xf32>, i32 -> vector<32x256xf32>
    %c5 = arith.constant 5 : index
    %c0_18 = arith.constant 0 : index
    %c0_19 = arith.constant 0 : index
    %51 = vector.load %arg6[%c5, %c0_18, %c0_19] : memref<9x1x256xf32, #tpu.memory_space<vmem>>, vector<1x1x256xf32>
    %52 = vector.shape_cast %51 : vector<1x1x256xf32> to vector<1x256xf32>
    %53 = vector.broadcast %52 : vector<1x256xf32> to vector<32x256xf32>
    %54 = arith.mulf %50, %53 : vector<32x256xf32>
    %55 = vector.extract_strided_slice %10 {offsets = [0, 5], sizes = [32, 1], strides = [1, 1]} : vector<32x9xf32> to vector<32x1xf32>
    %56 = vector.broadcast %55 : vector<32x1xf32> to vector<32x256xf32>
    %57 = arith.mulf %54, %56 : vector<32x256xf32>
    %58 = arith.addf %49, %57 : vector<32x256xf32>
    %c241_i32 = arith.constant 241 : i32
    %59 = tpu.dynamic_rotate %9 by %c241_i32 dim 1 : vector<32x256xf32>, i32 -> vector<32x256xf32>
    %c6 = arith.constant 6 : index
    %c0_20 = arith.constant 0 : index
    %c0_21 = arith.constant 0 : index
    %60 = vector.load %arg6[%c6, %c0_20, %c0_21] : memref<9x1x256xf32, #tpu.memory_space<vmem>>, vector<1x1x256xf32>
    %61 = vector.shape_cast %60 : vector<1x1x256xf32> to vector<1x256xf32>
    %62 = vector.broadcast %61 : vector<1x256xf32> to vector<32x256xf32>
    %63 = arith.mulf %59, %62 : vector<32x256xf32>
    %64 = vector.extract_strided_slice %10 {offsets = [0, 6], sizes = [32, 1], strides = [1, 1]} : vector<32x9xf32> to vector<32x1xf32>
    %65 = vector.broadcast %64 : vector<32x1xf32> to vector<32x256xf32>
    %66 = arith.mulf %63, %65 : vector<32x256xf32>
    %67 = arith.addf %58, %66 : vector<32x256xf32>
    %c240_i32 = arith.constant 240 : i32
    %68 = tpu.dynamic_rotate %9 by %c240_i32 dim 1 : vector<32x256xf32>, i32 -> vector<32x256xf32>
    %c7 = arith.constant 7 : index
    %c0_22 = arith.constant 0 : index
    %c0_23 = arith.constant 0 : index
    %69 = vector.load %arg6[%c7, %c0_22, %c0_23] : memref<9x1x256xf32, #tpu.memory_space<vmem>>, vector<1x1x256xf32>
    %70 = vector.shape_cast %69 : vector<1x1x256xf32> to vector<1x256xf32>
    %71 = vector.broadcast %70 : vector<1x256xf32> to vector<32x256xf32>
    %72 = arith.mulf %68, %71 : vector<32x256xf32>
    %73 = vector.extract_strided_slice %10 {offsets = [0, 7], sizes = [32, 1], strides = [1, 1]} : vector<32x9xf32> to vector<32x1xf32>
    %74 = vector.broadcast %73 : vector<32x1xf32> to vector<32x256xf32>
    %75 = arith.mulf %72, %74 : vector<32x256xf32>
    %76 = arith.addf %67, %75 : vector<32x256xf32>
    %c239_i32 = arith.constant 239 : i32
    %77 = tpu.dynamic_rotate %9 by %c239_i32 dim 1 : vector<32x256xf32>, i32 -> vector<32x256xf32>
    %c8 = arith.constant 8 : index
    %c0_24 = arith.constant 0 : index
    %c0_25 = arith.constant 0 : index
    %78 = vector.load %arg6[%c8, %c0_24, %c0_25] : memref<9x1x256xf32, #tpu.memory_space<vmem>>, vector<1x1x256xf32>
    %79 = vector.shape_cast %78 : vector<1x1x256xf32> to vector<1x256xf32>
    %80 = vector.broadcast %79 : vector<1x256xf32> to vector<32x256xf32>
    %81 = arith.mulf %77, %80 : vector<32x256xf32>
    %82 = vector.extract_strided_slice %10 {offsets = [0, 8], sizes = [32, 1], strides = [1, 1]} : vector<32x9xf32> to vector<32x1xf32>
    %83 = vector.broadcast %82 : vector<32x1xf32> to vector<32x256xf32>
    %84 = arith.mulf %81, %83 : vector<32x256xf32>
    %85 = arith.addf %76, %84 : vector<32x256xf32>
    %c0_26 = arith.constant 0 : index
    %c0_27 = arith.constant 0 : index
    %86 = vector.load %arg5[%c0_26, %c0_27] : memref<32x1xf32, #tpu.memory_space<vmem>>, vector<32x1xf32>
    %87 = vector.broadcast %86 : vector<32x1xf32> to vector<32x256xf32>
    %88 = arith.addf %85, %87 : vector<32x256xf32>
    %cst_28 = arith.constant 0.000000e+00 : f32
    %cst_29 = arith.constant 6.000000e+00 : f32
    %89 = vector.broadcast %cst_28 : f32 to vector<32x256xf32>
    %90 = arith.maximumf %89, %88 : vector<32x256xf32>
    %91 = vector.broadcast %cst_29 : f32 to vector<32x256xf32>
    %92 = arith.minimumf %91, %90 : vector<32x256xf32>
    %cst_30 = arith.constant dense<0.000000e+00> : vector<32xf32>
    %93 = vector.multi_reduction <add>, %92, %cst_30 [1] : vector<32x256xf32> to vector<32xf32>
    %94 = vector.shape_cast %93 : vector<32xf32> to vector<32x1xf32>
    %cst_31 = arith.constant 2.560000e+02 : f32
    %95 = vector.broadcast %cst_31 : f32 to vector<32x1xf32>
    %96 = arith.divf %94, %95 : vector<32x1xf32>
    %c0_32 = arith.constant 0 : index
    %c0_33 = arith.constant 0 : index
    %97 = vector.load %arg7[%c0_32, %c0_33] : memref<32x4xf32, #tpu.memory_space<vmem>>, vector<32x4xf32>
    %98 = vector.broadcast %96 : vector<32x1xf32> to vector<32x4xf32>
    %99 = arith.mulf %97, %98 : vector<32x4xf32>
    %cst_34 = arith.constant dense<0.000000e+00> : vector<4xf32>
    %100 = vector.multi_reduction <add>, %99, %cst_34 [0] : vector<32x4xf32> to vector<4xf32>
    %101 = vector.shape_cast %100 : vector<4xf32> to vector<1x4xf32>
    %c0_35 = arith.constant 0 : index
    %c0_36 = arith.constant 0 : index
    %102 = vector.load %arg8[%c0_35, %c0_36] : memref<1x4xf32, #tpu.memory_space<vmem>>, vector<1x4xf32>
    %103 = arith.addf %101, %102 : vector<1x4xf32>
    %cst_37 = arith.constant 0.000000e+00 : f32
    %104 = vector.broadcast %cst_37 : f32 to vector<1x4xf32>
    %105 = arith.maximumf %103, %104 : vector<1x4xf32>
    %c0_38 = arith.constant 0 : index
    %c0_39 = arith.constant 0 : index
    %106 = vector.load %arg9[%c0_38, %c0_39] : memref<32x4xf32, #tpu.memory_space<vmem>>, vector<32x4xf32>
    %107 = vector.broadcast %105 : vector<1x4xf32> to vector<32x4xf32>
    %108 = arith.mulf %106, %107 : vector<32x4xf32>
    %cst_40 = arith.constant dense<0.000000e+00> : vector<32xf32>
    %109 = vector.multi_reduction <add>, %108, %cst_40 [1] : vector<32x4xf32> to vector<32xf32>
    %110 = vector.shape_cast %109 : vector<32xf32> to vector<32x1xf32>
    %c0_41 = arith.constant 0 : index
    %c0_42 = arith.constant 0 : index
    %111 = vector.load %arg10[%c0_41, %c0_42] : memref<32x1xf32, #tpu.memory_space<vmem>>, vector<32x1xf32>
    %112 = arith.addf %110, %111 : vector<32x1xf32>
    %113 = arith.negf %112 : vector<32x1xf32>
    %114 = math.exp %113 : vector<32x1xf32>
    %cst_43 = arith.constant 1.000000e+00 : f32
    %115 = vector.broadcast %cst_43 : f32 to vector<32x1xf32>
    %116 = arith.addf %115, %114 : vector<32x1xf32>
    %117 = arith.divf %115, %116 : vector<32x1xf32>
    %118 = vector.broadcast %117 : vector<32x1xf32> to vector<32x256xf32>
    %119 = arith.mulf %92, %118 : vector<32x256xf32>
    %120 = arith.truncf %119 : vector<32x256xf32> to vector<32x256xbf16>
    %c0_44 = arith.constant 0 : index
    %c0_45 = arith.constant 0 : index
    %121 = vector.load %arg11[%c0_44, %c0_45] : memref<16x32xbf16, #tpu.memory_space<vmem>>, vector<16x32xbf16>
    %cst_46 = arith.constant dense<0.000000e+00> : vector<16x256xf32>
    %122 = tpu.matmul %121, %120, %cst_46 {dimension_numbers = #tpu.dot_dimension_numbers<[1], [0], [0], [1], [0, 0, 1, 1], [], []>} : vector<16x32xbf16>, vector<32x256xbf16>, vector<16x256xf32> -> vector<16x256xf32>
    %c0_47 = arith.constant 0 : index
    %c0_48 = arith.constant 0 : index
    %123 = vector.load %arg12[%c0_47, %c0_48] : memref<16x1xf32, #tpu.memory_space<vmem>>, vector<16x1xf32>
    %124 = vector.broadcast %123 : vector<16x1xf32> to vector<16x256xf32>
    %125 = arith.addf %122, %124 : vector<16x256xf32>
    %c0_49 = arith.constant 0 : index
    %c0_50 = arith.constant 0 : index
    %126 = vector.load %arg1[%c0_49, %c0_50] : memref<16x256xbf16, #tpu.memory_space<vmem>>, vector<16x256xbf16>
    %127 = arith.extf %126 : vector<16x256xbf16> to vector<16x256xf32>
    %128 = arith.addf %125, %127 : vector<16x256xf32>
    %129 = arith.truncf %128 : vector<16x256xf32> to vector<16x256xbf16>
    %c0_51 = arith.constant 0 : index
    %c0_52 = arith.constant 0 : index
    %130 = vector.load %arg13[%c0_51, %c0_52] : memref<16x256xbf16, #tpu.memory_space<vmem>>, vector<16x256xbf16>
    tpu.vector_store %arg13[%c0_51, %c0_52], %129 {strides = array<i32>} : memref<16x256xbf16, #tpu.memory_space<vmem>>, vector<16x256xbf16>,
    return
  }
  func.func @transform_0(%arg0: i32) -> (i32, i32) {
    %c0_i32 = arith.constant 0 : i32
    %c0_i32_0 = arith.constant 0 : i32
    return %arg0, %c0_i32 : i32, i32
  }
  func.func @transform_1(%arg0: i32) -> (i32, i32) {
    %c0_i32 = arith.constant 0 : i32
    %c0_i32_0 = arith.constant 0 : i32
    %c0_i32_1 = arith.constant 0 : i32
    return %c0_i32, %c0_i32_0 : i32, i32
  }
  func.func @transform_2(%arg0: i32) -> (i32, i32) {
    %c0_i32 = arith.constant 0 : i32
    %c0_i32_0 = arith.constant 0 : i32
    %c0_i32_1 = arith.constant 0 : i32
    return %c0_i32, %c0_i32_0 : i32, i32
  }
  func.func @transform_3(%arg0: i32) -> (i32, i32) {
    %c0_i32 = arith.constant 0 : i32
    %c0_i32_0 = arith.constant 0 : i32
    %c0_i32_1 = arith.constant 0 : i32
    return %c0_i32, %c0_i32_0 : i32, i32
  }
  func.func @transform_4(%arg0: i32) -> (i32, i32) {
    %c0_i32 = arith.constant 0 : i32
    %c0_i32_0 = arith.constant 0 : i32
    %c0_i32_1 = arith.constant 0 : i32
    return %c0_i32, %c0_i32_0 : i32, i32
  }
  func.func @transform_5(%arg0: i32) -> (i32, i32, i32) {
    %c0_i32 = arith.constant 0 : i32
    %c0_i32_0 = arith.constant 0 : i32
    %c0_i32_1 = arith.constant 0 : i32
    %c0_i32_2 = arith.constant 0 : i32
    return %c0_i32, %c0_i32_0, %c0_i32_1 : i32, i32, i32
  }
  func.func @transform_6(%arg0: i32) -> (i32, i32) {
    %c0_i32 = arith.constant 0 : i32
    %c0_i32_0 = arith.constant 0 : i32
    %c0_i32_1 = arith.constant 0 : i32
    return %c0_i32, %c0_i32_0 : i32, i32
  }
  func.func @transform_7(%arg0: i32) -> (i32, i32) {
    %c0_i32 = arith.constant 0 : i32
    %c0_i32_0 = arith.constant 0 : i32
    %c0_i32_1 = arith.constant 0 : i32
    return %c0_i32, %c0_i32_0 : i32, i32
  }
  func.func @transform_8(%arg0: i32) -> (i32, i32) {
    %c0_i32 = arith.constant 0 : i32
    %c0_i32_0 = arith.constant 0 : i32
    %c0_i32_1 = arith.constant 0 : i32
    return %c0_i32, %c0_i32_0 : i32, i32
  }
  func.func @transform_9(%arg0: i32) -> (i32, i32) {
    %c0_i32 = arith.constant 0 : i32
    %c0_i32_0 = arith.constant 0 : i32
    %c0_i32_1 = arith.constant 0 : i32
    return %c0_i32, %c0_i32_0 : i32, i32
  }
  func.func @transform_10(%arg0: i32) -> (i32, i32) {
    %c0_i32 = arith.constant 0 : i32
    %c0_i32_0 = arith.constant 0 : i32
    %c0_i32_1 = arith.constant 0 : i32
    return %c0_i32, %c0_i32_0 : i32, i32
  }
  func.func @transform_11(%arg0: i32) -> (i32, i32) {
    %c0_i32 = arith.constant 0 : i32
    %c0_i32_0 = arith.constant 0 : i32
    %c0_i32_1 = arith.constant 0 : i32
    return %c0_i32, %c0_i32_0 : i32, i32
  }
  func.func @transform_12(%arg0: i32) -> (i32, i32) {
    %c0_i32 = arith.constant 0 : i32
    %c0_i32_0 = arith.constant 0 : i32
    return %arg0, %c0_i32 : i32, i32
  }
}

</mosaic_0001>

<bundles_post_ra>
// kernel: mbconv_forward.1
= control target key start
LH: loop header
LB: loop body
LE: loop exit
PB: predicated region body
PF: predicated region fallthrough
CT: control target
= control target key end

     0   :  { %s1717_s21 = smov 0   ;;  %s2512_s0 = inlined_call_operand.vmem [shape: bf16[32,256], index: 0, kind: input, shape index: {}]   ;;  %s2513_s1 = inlined_call_operand.vmem [shape: bf16[32,16], index: 1, kind: input, shape index: {}]   ;;  %s2514_s2 = inlined_call_operand.vmem [shape: f32[32,1], index: 2, kind: input, shape index: {}]   ;;  %s2515_s3 = inlined_call_operand.vmem [shape: f32[32,9], index: 3, kind: input, shape index: {}]   ;;  %s2516_s4 = inlined_call_operand.vmem [shape: f32[32,1], index: 4, kind: input, shape index: {}]   ;;  %s2517_s5 = inlined_call_operand.vmem [shape: f32[9,1,256], index: 5, kind: input, shape index: {}]   ;;  %s2518_s6 = inlined_call_operand.vmem [shape: f32[32,4], index: 6, kind: input, shape index: {}]   ;;  %s2519_s7 = inlined_call_operand.vmem [shape: f32[1,4], index: 7, kind: input, shape index: {}]   ;;  %s2520_s8 = inlined_call_operand.vmem [shape: f32[32,4], index: 8, kind: input, shape index: {}]   ;;  %s2521_s9 = inlined_call_operand.vmem [shape: f32[32,1], index: 9, kind: input, shape index: {}]   ;;  %s2522_s10 = inlined_call_operand.vmem [shape: bf16[16,32], index: 10, kind: input, shape index: {}]   ;;  %s2523_s11 = inlined_call_operand.vmem [shape: f32[16,1], index: 11, kind: input, shape index: {}]   ;;  %s2524_s12 = inlined_call_operand.vmem [shape: bf16[32,256], index: 12, kind: output, shape index: {}]  }
   0x1 LB: > { %s1497_s22 = sadd.s32 4294967295, %s1632_s21   ;;  %p1501_p0 = scmp.ge.s32.totalorder %s1632_s21, 1  ;;  %s1632_s21 = sphi %s1717_s21, %s22_s21  }
   0x2   : > { %p364_p1 = scmp.lt.s32.totalorder %s1632_s21, 3 }
   0x4   : > { %p365_p2 = pnand %p1501_p0, %p364_p1 }
   0x5   : > { %s1502_s27 = sshll.u32 (!%p365_p2), %s1497_s22, 1  ;;  %s1639_s15 = smov (!%p365_p2), 16  }
   0x6   : > { %368 = sbr.rel (%p365_p2) target bundleno = 1076 (0x434), region = 68  ;;  %p409_p3 = scmp.lt.s32.totalorder (!%p365_p2), %s1502_s27, 3 }
   0x7   : > { %s1640_s16 = smov (!%p365_p2), 17   ;;  %s1641_s18 = smov (!%p365_p2), 15  }
   0x8   : > { %s1642_s19 = smov (!%p365_p2), 113   ;;  %s1643_s20 = smov (!%p365_p2), 1  }
   0x9   : > { %s1644_s22 = smov (!%p365_p2), 127   ;;  %s1647_s13 = smov (!%p365_p2), 112  }
   0xb   : > { %v431_v0 = vld [vmem:[%s2514_s2 + $0x10] sm:$0xff]  ;;  %v429_v1 = vld [vmem:[%s2514_s2] sm:$0xff]  ;;  %v2525_v2 = vmov 0   ;;  %s2533_s27 = smov (!%p409_p3, %s1502_s27), 3  ;;  %v432_v3 = vld [vmem:[%s2514_s2 + $0x18] sm:$0xff]  ;;  %vm473_vm0 = vcmask 130048  }
   0xc   : > { %1581 = vset.pattern.permute.xlu1 %v2525_v2  ;;  %1580 = vset.pattern.permute.xlu0 %v2525_v2  ;;  %s1547_s28 = sshll.u32 %s2533_s27, 3  ;;  %v430_v4 = vld [vmem:[%s2514_s2 + $0x8] sm:$0xff]  ;;  %v1549_v11 = vld [vmem:[%s2513_s1] sm:$0xff]  ;;  %v1760_v12 = vld [vmem:[%s2515_s3 + $0x10] sm:$0xff]  ;;  %v1635_v15 = vmov 1   ;;  %v1636_v18 = vmov 2  }
   0xd   : > { %445 = vperm.xlu1 %1581, %v431_v0   ;;  %435 = vperm.xlu0 %1580, %v429_v1   ;;  %s1748_s17 = scalar_lea.vmem %s2512_s0, %s1547_s28  ;;  %v1768_v13 = vld [vmem:[%s2515_s3 + $0x8] sm:$0xff]  ;;  %v1773_v14 = vld [vmem:[%s2515_s3] sm:$0xff]  ;;  %v1781_v16 = vld [vmem:[%s2515_s3 + $0x18] sm:$0xff]  ;;  %v1637_v19 = vmov 3   ;;  %v1638_v20 = vmov 4   ;;  %v1645_v60 = vmov 5   ;;  %s420_s29 = scalar_lea.vmem %s2524_s12, %s1547_s28 }
   0xe   : > { %1582 = vset.pattern.permute.xlu2 %v2525_v2  ;;  %v1518_v5 = vld [vmem:[%s1748_s17] sm:$0xf]  ;;  %v1552_v6 = vld [vmem:[%s1748_s17 + $0x4] sm:$0xf0]  ;;  %v1551_v7 = vld [vmem:[%s1748_s17 + $0x4] sm:$0xf] }
   0xf   : > { %v1519_v8 = vor.u32 %v1552_v6, %v1518_v5  ;;  %v1520_v9 = vld [vmem:[%s1748_s17 + $0x8] sm:$0xf0]  ;;  %591 = vperm.xlu2 %1582, %v1760_v12   ;;  %vm1222_vm10 = vcmask 31744  }
  0x10   : > { %v1523_v10 = vor.u32 %v1551_v7, %v1520_v9  ;;  %v1550_v17 = vld [vmem:[%s2513_s1 + $0x8] sm:$0xff] }
  0x11   : > { %487 = vmatpush.bf16.msra.mxu0 %v1519_v8  ;;  %v554_v8 = vlaneseq }
  0x12   : > { %506 = vmatpush.bf16.msra.mxu1 %v1523_v10 }
  0x13   : > { %v1915_v10 = vand.u32 127, %v554_v8 }
  0x14   : > { %1524 = vmatmul.msk.bf16.vlgmr.msra.gmra.mxu0 %vm473_vm0, %v1549_v11 }
  0x15   : > { %450 = vperm.xlu1 %1581, %v432_v3   ;;  %440 = vperm.xlu0 %1580, %v430_v4   ;;  %vm556_vm1 = vcmp.lt.s32.totalorder %v1915_v10, 17  ;;  %vm623_vm2 = vcmp.lt.s32.totalorder %v1915_v10, 16  ;;  %vm695_vm3 = vcmp.lt.s32.totalorder %v1915_v10, 15  ;;  %vm767_vm4 = vcmp.lt.s32.totalorder %v1915_v10, 1 }
  0x16   : > { %1526 = vmatmul.msk.bf16.vlgmr.msra.gmra.mxu1 %vm473_vm0, %v1549_v11  ;;  %vm871_vm5 = vcmp.lt.s32.totalorder %v1915_v10, 127  ;;  %vm943_vm6 = vcmp.lt.s32.totalorder %v1915_v10, 113  ;;  %vm1015_vm7 = vcmp.lt.s32.totalorder %v1915_v10, 112  ;;  %vm1087_vm8 = vcmp.lt.s32.totalorder %v1915_v10, 111 }
  0x17   : > { %1585 = vset.pattern.permute.xlu2 %v1635_v15 }
  0x18   : > { %656 = vperm.xlu2 %1585, %v1760_v12  }
  0x1d   : > { %586 = vperm.xlu1 %1581, %v1768_v13   ;;  %581 = vperm.xlu0 %1580, %v1773_v14  }
  0x20   : > { %1587 = vset.pattern.permute.xlu2 %v1636_v18 }
  0x21   : > { %724 = vperm.xlu2 %1587, %v1768_v13  }
  0x24   : > { %1525 = vmatmul.msk.bf16.gmra.mxu0 %vm473_vm0, %v1550_v17 }
  0x25   : > { %1584 = vset.pattern.permute.xlu1 %v1635_v15  ;;  %596 = vperm.xlu0 %1580, %v1781_v16  }
  0x26   : > { %652 = vperm.xlu1 %1584, %v1768_v13   ;;  %1527 = vmatmul.msk.bf16.gmra.mxu1 %vm473_vm0, %v1550_v17 }
  0x29   : > { %1590 = vset.pattern.permute.xlu2 %v1637_v19 }
  0x2a   : > { %796 = vperm.xlu2 %1590, %v1768_v13  }
  0x2d   : > { %1583 = vset.pattern.permute.xlu0 %v1635_v15 }
  0x2e   : > { %660 = vperm.xlu1 %1584, %v1781_v16   ;;  %648 = vperm.xlu0 %1583, %v1773_v14  }
  0x32   : > { %800 = vperm.xlu2 %1590, %v1760_v12  }
  0x36   : > { %1586 = vset.pattern.permute.xlu1 %v1636_v18  ;;  %1588 = vset.pattern.permute.xlu0 %v1636_v18 }
  0x37   : > { %720 = vperm.xlu1 %1586, %v1773_v14   ;;  %728 = vperm.xlu0 %1588, %v1760_v12  }
  0x3a   : > { %1595 = vset.pattern.permute.xlu2 %v1645_v60 }
  0x3f   : > { %1589 = vset.pattern.permute.xlu1 %v1637_v19  ;;  %1592 = vset.pattern.permute.xlu0 %v1638_v20 }
  0x40   : > { %792 = vperm.xlu1 %1589, %v1773_v14   ;;  %824 = vperm.xlu0 %1592, %v1773_v14  }
  0x48   : > { %1591 = vset.pattern.permute.xlu1 %v1636_v18  ;;  %1594 = vset.pattern.permute.xlu0 %v1637_v19 }
  0x49   : > { %732 = vperm.xlu1 %1591, %v1781_v16  }
  0x51   : > { %1593 = vset.pattern.permute.xlu1 %v1638_v20 }
  0x52   : > { %828 = vperm.xlu1 %1593, %v1768_v13  }
  0x69   : > { %v1849_v45 = vpop.permute.xlu2 %591 }
  0x72   : > { %v1859_v50 = vpop.permute.xlu2 %656 }
  0x7b   : > { %v1871_v53 = vpop.permute.xlu2 %724 }
  0x7f   : > { %v436_v21 = vpop.permute.xlu0 %435  ;;  %v446_v39 = vpop.permute.xlu1 %445 }
  0x84   : > { %v1883_v58 = vpop.permute.xlu2 %796 }
  0x87   : > { %v441_v31 = vpop.permute.xlu0 %440  ;;  %v451_v43 = vpop.permute.xlu1 %450 }
  0x8c   : > { %v1903_v3 = vpop.permute.xlu2 %800 }
  0x8f   : > { %v1851_v47 = vpop.permute.xlu1 %586  ;;  %v1881_v56 = vpop.permute.xlu0 %581 }
  0x91   : > { %v489_v22 = vpop.f32.mrf.mxu0 }
  0x92   : > { %v490_v24 = vadd.f32 %v489_v22, %v436_v21 }
  0x93   : > { %v508_v23 = vpop.f32.mrf.mxu1 }
  0x94   : > { %v509_v25 = vadd.f32 %v508_v23, %v436_v21  ;;  %v518_v26 = vmax.f32 %v490_v24, 0.0  ;;  %v1646_v23 = vmov 6  }
  0x96   : > { %v519_v27 = vmax.f32 %v509_v25, 0.0  ;;  %v1803_v28 = vmin.f32 %v518_v26, 6.0  ;;  %v565_v25 = vld [vmem:[%s2517_s5] sm:$0x3]  ;;  %v1528_v26 = vld [vmem:[%s2517_s5 + $0x2] sm:$0x3] }
  0x97   : > { %v1895_v0 = vpop.permute.xlu0 %596 }
  0x98   : > { %v1805_v29 = vmin.f32 %v519_v27, 6.0  ;;  %607 = vrot.lane.b32.xlu1 %v1803_v28, %s1639_s15  ;;  %538 = vrot.lane.b32.xlu2 %v1803_v28, %s1640_s16  ;;  %v1863_v52 = vpop.permute.xlu1 %652  ;;  %v1947_v27 = vperm.slane %v565_v25, 0 }
  0x99   : > { %v491_v34 = vpop.f32.mrf.mxu0 }
  0x9a   : > { %687 = vrot.lane.b32.xlu0 %v1805_v29, %s1641_s18  ;;  %v492_v35 = vadd.f32 %v491_v34, %v441_v31 }
  0x9b   : > { %v510_v30 = vpop.f32.mrf.mxu1 }
  0x9c   : > { %v511_v32 = vadd.f32 %v510_v30, %v441_v31  ;;  %v520_v37 = vmax.f32 %v492_v35, 0.0  ;;  %v1949_v30 = vperm.slane %v565_v25, 1  ;;  %v1529_v31 = vld [vmem:[%s2517_s5 + $0x4] sm:$0x3] }
  0x9d   : > { %v1965_v34 = vperm.slane %v1529_v31, 0  ;;  %v1967_v35 = vperm.slane %v1529_v31, 1 }
  0x9e   : > { %v521_v33 = vmax.f32 %v511_v32, 0.0  ;;  %v1827_v38 = vmin.f32 %v520_v37, 6.0  ;;  %v1957_v32 = vperm.slane %v1528_v26, 0 }
  0xa0   : > { %935 = vrot.lane.b32.xlu1 %v1805_v29, %s1642_s19  ;;  %546 = vrot.lane.b32.xlu2 %v1805_v29, %s1640_s16  ;;  %v1819_v36 = vmin.f32 %v521_v33, 6.0  ;;  %v1879_v54 = vpop.permute.xlu1 %660  ;;  %v649_v6 = vpop.permute.xlu0 %648  ;;  %v1959_v33 = vperm.slane %v1528_v26, 1 }
  0xa1   : > { %v494_v46 = vpop.f32.mrf.mxu0 }
  0xa2   : > { %751 = vrot.lane.b32.xlu0 %v1803_v28, %s1643_s20  ;;  %v495_v48 = vadd.f32 %v494_v46, %v446_v39 }
  0xa3   : > { %v513_v40 = vpop.f32.mrf.mxu1 }
  0xa4   : > { %v514_v41 = vadd.f32 %v513_v40, %v446_v39  ;;  %v522_v49 = vmax.f32 %v495_v48, 0.0 }
  0xa6   : > { %v523_v42 = vmax.f32 %v514_v41, 0.0  ;;  %v1861_v51 = vmin.f32 %v522_v49, 6.0 }
  0xa8   : > { %689 = vrot.lane.b32.xlu1 %v1819_v36, %s1641_s18  ;;  %615 = vrot.lane.b32.xlu2 %v1805_v29, %s1639_s15  ;;  %v1841_v44 = vmin.f32 %v523_v42, 6.0 }
  0xa9   : > { %v496_v55 = vpop.f32.mrf.mxu0  ;;  %v1891_v61 = vpop.permute.xlu1 %720 }
  0xaa   : > { %855 = vrot.lane.b32.xlu0 %v1803_v28, %s1644_s22  ;;  %v497_v57 = vadd.f32 %v496_v55, %v451_v43  ;;  %v1924_v15 = vpop.permute.xlu0 %728 }
  0xab   : > { %v515_v62 = vpop.f32.mrf.mxu1 }
  0xac   : > { %v524_v59 = vmax.f32 %v497_v57, 0.0  ;;  %v516_v1 = vadd.f32 %v515_v62, %v451_v43 }
  0xae   : > { %v1893_v63 = vmin.f32 %v524_v59, 6.0  ;;  %v525_v4 = vmax.f32 %v516_v1, 0.0 }
  0xb0   : > { %753 = vrot.lane.b32.xlu1 %v1827_v38, %s1643_s20  ;;  %679 = vrot.lane.b32.xlu2 %v1803_v28, %s1641_s18  ;;  %v1907_v7 = vmin.f32 %v525_v4, 6.0 }
  0xb2   : > { %548 = vrot.lane.b32.xlu0 %v1819_v36, %s1640_s16  ;;  %v1905_v5 = vpop.permute.xlu1 %792  ;;  %v1939_v24 = vpop.permute.xlu0 %824 }
  0xb8   : > { %857 = vrot.lane.b32.xlu1 %v1827_v38, %s1644_s22  ;;  %759 = vrot.lane.b32.xlu2 %v1805_v29, %s1643_s20 }
  0xba   : > { %617 = vrot.lane.b32.xlu0 %v1819_v36, %s1639_s15 }
  0xbb   : > { %v1917_v11 = vpop.permute.xlu1 %732 }
  0xc0   : > { %550 = vrot.lane.b32.xlu1 %v1841_v44, %s1640_s16  ;;  %863 = vrot.lane.b32.xlu2 %v1805_v29, %s1644_s22 }
  0xc2   : > { %681 = vrot.lane.b32.xlu0 %v1827_v38, %s1641_s18 }
  0xc4   : > { %v1936_v21 = vpop.permute.xlu1 %828 }
  0xc8   : > { %619 = vrot.lane.b32.xlu1 %v1841_v44, %s1639_s15  ;;  %927 = vrot.lane.b32.xlu2 %v1803_v28, %s1642_s19 }
  0xca   : > { %761 = vrot.lane.b32.xlu0 %v1819_v36, %s1643_s20 }
  0xd0   : > { %683 = vrot.lane.b32.xlu1 %v1861_v51, %s1641_s18  ;;  %540 = vrot.lane.b32.xlu2 %v1827_v38, %s1640_s16 }
  0xd2   : > { %865 = vrot.lane.b32.xlu0 %v1819_v36, %s1644_s22 }
  0xd8   : > { %755 = vrot.lane.b32.xlu1 %v1861_v51, %s1643_s20  ;;  %609 = vrot.lane.b32.xlu2 %v1827_v38, %s1639_s15 }
  0xda   : > { %929 = vrot.lane.b32.xlu0 %v1827_v38, %s1642_s19 }
  0xe0   : > { %867 = vrot.lane.b32.xlu1 %v1841_v44, %s1644_s22  ;;  %937 = vrot.lane.b32.xlu2 %v1819_v36, %s1642_s19 }
  0xe2   : > { %542 = vrot.lane.b32.xlu0 %v1861_v51, %s1640_s16 }
  0xe8   : > { %544 = vrot.lane.b32.xlu1 %v1893_v63, %s1640_s16  ;;  %691 = vrot.lane.b32.xlu2 %v1841_v44, %s1641_s18 }
  0xea   : > { %611 = vrot.lane.b32.xlu0 %v1861_v51, %s1639_s15 }
  0xf0   : > { %613 = vrot.lane.b32.xlu1 %v1893_v63, %s1639_s15  ;;  %763 = vrot.lane.b32.xlu2 %v1841_v44, %s1643_s20 }
  0xf2   : > { %693 = vrot.lane.b32.xlu0 %v1907_v7, %s1641_s18  ;;  %v539_v9 = vpop.permute.xlu2 %538 }
  0xf8   : > { %757 = vrot.lane.b32.xlu1 %v1893_v63, %s1643_s20  ;;  %859 = vrot.lane.b32.xlu2 %v1861_v51, %s1644_s22 }
  0xfa   : > { %804 = vperm.xlu0 %1594, %v1781_v16   ;;  %v547_v17 = vpop.permute.xlu2 %546 }
  0xfb   : > { %v557_v18 = vsel %vm556_vm1, %v539_v9, %v547_v17  ;;  %v561_v19 = vsel %vm556_vm1, %v547_v17, %v539_v9  ;;  %v1530_v9 = vld [vmem:[%s2517_s5 + $0x6] sm:$0x3] }
  0xfc   : > { %v571_v37 = vmul.f32 %v1947_v27, %v561_v19  ;;  %v572_v39 = vmul.f32 %v1949_v30, %v557_v18 }
  0xfe   : > { %v599_v62 = vmul.f32 %v1881_v56, %v571_v37  ;;  %v600_v1 = vmul.f32 %v1881_v56, %v572_v39  ;;  %v1997_v56 = vperm.slane %v1530_v9, 0 }
 0x100   : > { %832 = vperm.xlu1 %1593, %v1760_v12   ;;  %552 = vrot.lane.b32.xlu2 %v1907_v7, %s1640_s16  ;;  %s1648_s16 = smov 111  }
 0x102   : > { %869 = vrot.lane.b32.xlu0 %v1907_v7, %s1644_s22  ;;  %v616_v22 = vpop.permute.xlu2 %615 }
 0x103   : > { %1598 = vset.pattern.permute.xlu0 %v1646_v23 }
 0x108   : > { %1596 = vset.pattern.permute.xlu1 %v1645_v60  ;;  %621 = vrot.lane.b32.xlu2 %v1907_v7, %s1639_s15 }
 0x109   : > { %900 = vperm.xlu1 %1596, %v1768_v13  }
 0x10a   : > { %999 = vrot.lane.b32.xlu0 %v1803_v28, %s1647_s13  ;;  %v608_v40 = vpop.permute.xlu1 %607  ;;  %v680_v41 = vpop.permute.xlu2 %679 }
 0x10b   : > { %v624_v42 = vsel %vm623_vm2, %v608_v40, %v616_v22  ;;  %v628_v43 = vsel %vm623_vm2, %v616_v22, %v608_v40 }
 0x10c   : > { %v688_v46 = vpop.permute.xlu0 %687  ;;  %v639_v48 = vmul.f32 %v1957_v32, %v628_v43  ;;  %v640_v49 = vmul.f32 %v1959_v33, %v624_v42 }
 0x10d   : > { %v696_v55 = vsel %vm695_vm3, %v680_v41, %v688_v46  ;;  %v700_v57 = vsel %vm695_vm3, %v688_v46, %v680_v41 }
 0x10e   : > { %v711_v59 = vmul.f32 %v1965_v34, %v700_v57  ;;  %v712_v60 = vmul.f32 %v1967_v35, %v696_v55  ;;  %v663_v4 = vmul.f32 %v649_v6, %v639_v48  ;;  %v664_v8 = vmul.f32 %v649_v6, %v640_v49 }
 0x10f   : > { %v1999_v6 = vperm.slane %v1530_v9, 1 }
 0x110   : > { %v671_v17 = vadd.f32 %v663_v4, %v599_v62  ;;  %v672_v18 = vadd.f32 %v664_v8, %v600_v1  ;;  %v735_v19 = vmul.f32 %v1891_v61, %v711_v59  ;;  %v736_v22 = vmul.f32 %v1891_v61, %v712_v60  ;;  %685 = vrot.lane.b32.xlu2 %v1893_v63, %s1641_s18 }
 0x111   : > { %931 = vrot.lane.b32.xlu1 %v1861_v51, %s1642_s19 }
 0x112   : > { %1009 = vrot.lane.b32.xlu0 %v1819_v36, %s1647_s13  ;;  %v743_v25 = vadd.f32 %v735_v19, %v671_v17  ;;  %v744_v26 = vadd.f32 %v736_v22, %v672_v18  ;;  %v936_v31 = vpop.permute.xlu1 %935  ;;  %v760_v37 = vpop.permute.xlu2 %759  ;;  %1597 = vset.pattern.permute.xlu1 %v1638_v20 }
 0x114   : > { %v752_v61 = vpop.permute.xlu0 %751 }
 0x115   : > { %v768_v39 = vsel %vm767_vm4, %v752_v61, %v760_v37  ;;  %v772_v40 = vsel %vm767_vm4, %v760_v37, %v752_v61 }
 0x116   : > { %v783_v41 = vmul.f32 %v1997_v56, %v772_v40  ;;  %v784_v42 = vmul.f32 %v1999_v6, %v768_v39 }
 0x118   : > { %v807_v43 = vmul.f32 %v1905_v5, %v783_v41  ;;  %v808_v46 = vmul.f32 %v1905_v5, %v784_v42  ;;  %765 = vrot.lane.b32.xlu2 %v1907_v7, %s1643_s20  ;;  %v2527_v41 = vmov 7  }
 0x119   : > { %1001 = vrot.lane.b32.xlu1 %v1827_v38, %s1647_s13 }
 0x11a   : > { %v2012_v48 = vadd.f32 %v807_v43, %v743_v25  ;;  %v2014_v20 = vadd.f32 %v808_v46, %v744_v26  ;;  %968 = vperm.xlu0 %1598, %v1773_v14   ;;  %v690_v49 = vpop.permute.xlu1 %689  ;;  %v864_v55 = vpop.permute.xlu2 %863 }
 0x11c   : > { %v856_v57 = vpop.permute.xlu0 %855 }
 0x11d   : > { %v2022_v5 = vsel %vm871_vm5, %v856_v57, %v864_v55  ;;  %v2026_v59 = vsel %vm871_vm5, %v864_v55, %v856_v57 }
 0x120   : > { %896 = vperm.xlu2 %1595, %v1773_v14  }
 0x121   : > { %836 = vperm.xlu1 %1597, %v1781_v16  }
 0x122   : > { %1011 = vrot.lane.b32.xlu0 %v1841_v44, %s1647_s13  ;;  %v754_v60 = vpop.permute.xlu1 %753  ;;  %v928_v62 = vpop.permute.xlu2 %927 }
 0x123   : > { %v2035_v4 = vsel %vm943_vm6, %v928_v62, %v936_v31  ;;  %v2039_v8 = vsel %vm943_vm6, %v936_v31, %v928_v62 }
 0x124   : > { %v549_v1 = vpop.permute.xlu0 %548 }
 0x128   : > { %861 = vrot.lane.b32.xlu2 %v1893_v63, %s1644_s22 }
 0x129   : > { %1599 = vset.pattern.permute.xlu1 %v1646_v23 }
 0x12a   : > { %1079 = vrot.lane.b32.xlu0 %v1805_v29, %s1648_s16  ;;  %972 = vperm.xlu1 %1599, %v1768_v13   ;;  %v858_v9 = vpop.permute.xlu1 %857  ;;  %v541_v17 = vpop.permute.xlu2 %540 }
 0x12b   : > { %v558_v19 = vsel %vm556_vm1, %v541_v17, %v549_v1  ;;  %v562_v22 = vsel %vm556_vm1, %v549_v1, %v541_v17 }
 0x12c   : > { %v618_v18 = vpop.permute.xlu0 %617  ;;  %v573_v25 = vmul.f32 %v1947_v27, %v562_v22  ;;  %v574_v26 = vmul.f32 %v1949_v30, %v558_v19 }
 0x12e   : > { %v601_v1 = vmul.f32 %v1851_v47, %v573_v25  ;;  %v602_v17 = vmul.f32 %v1851_v47, %v574_v26 }
 0x130   : > { %939 = vrot.lane.b32.xlu2 %v1841_v44, %s1642_s19 }
 0x132   : > { %976 = vperm.xlu0 %1598, %v1760_v12   ;;  %941 = vrot.lane.b32.xlu1 %v1907_v7, %s1642_s19  ;;  %v2058_v31 = vpop.permute.xlu1 %550  ;;  %v610_v37 = vpop.permute.xlu2 %609 }
 0x133   : > { %v625_v39 = vsel %vm623_vm2, %v610_v37, %v618_v18  ;;  %v629_v40 = vsel %vm623_vm2, %v618_v18, %v610_v37  ;;  %1600 = vset.pattern.permute.xlu1 %v2527_v41 }
 0x134   : > { %v682_v61 = vpop.permute.xlu0 %681  ;;  %v641_v46 = vmul.f32 %v1957_v32, %v629_v40  ;;  %v642_v55 = vmul.f32 %v1959_v33, %v625_v39 }
 0x135   : > { %v697_v42 = vsel %vm695_vm3, %v682_v61, %v690_v49  ;;  %v701_v43 = vsel %vm695_vm3, %v690_v49, %v682_v61 }
 0x136   : > { %v713_v57 = vmul.f32 %v1965_v34, %v701_v43  ;;  %v714_v62 = vmul.f32 %v1967_v35, %v697_v42  ;;  %v665_v18 = vmul.f32 %v1863_v52, %v641_v46  ;;  %v666_v19 = vmul.f32 %v1863_v52, %v642_v55 }
 0x137   : > { %v2528_v52 = vmov 8  }
 0x138   : > { %v737_v22 = vmul.f32 %v1871_v53, %v713_v57  ;;  %v738_v49 = vmul.f32 %v1871_v53, %v714_v62  ;;  %v673_v37 = vadd.f32 %v665_v18, %v601_v1  ;;  %v674_v61 = vadd.f32 %v666_v19, %v602_v17  ;;  %1007 = vrot.lane.b32.xlu2 %v1805_v29, %s1647_s13 }
 0x13a   : > { %1005 = vrot.lane.b32.xlu0 %v1893_v63, %s1647_s13  ;;  %1071 = vrot.lane.b32.xlu1 %v1803_v28, %s1648_s16  ;;  %v620_v47 = vpop.permute.xlu1 %619  ;;  %v745_v25 = vadd.f32 %v737_v22, %v673_v37  ;;  %v746_v26 = vadd.f32 %v738_v49, %v674_v61  ;;  %v938_v39 = vpop.permute.xlu2 %937 }
 0x13b   : > { %1603 = vset.pattern.permute.xlu0 %v2528_v52 }
 0x13c   : > { %v762_v40 = vpop.permute.xlu0 %761 }
 0x13d   : > { %v769_v53 = vsel %vm767_vm4, %v754_v60, %v762_v40  ;;  %v773_v42 = vsel %vm767_vm4, %v762_v40, %v754_v60 }
 0x13e   : > { %v785_v43 = vmul.f32 %v1997_v56, %v773_v42  ;;  %v786_v46 = vmul.f32 %v1999_v6, %v769_v53 }
 0x140   : > { %v809_v55 = vmul.f32 %v1883_v58, %v785_v43  ;;  %v810_v57 = vmul.f32 %v1883_v58, %v786_v46  ;;  %904 = vperm.xlu2 %1595, %v1760_v12  }
 0x142   : > { %v2095_v62 = vadd.f32 %v809_v55, %v745_v25  ;;  %v2097_v1 = vadd.f32 %v810_v57, %v746_v26  ;;  %1083 = vrot.lane.b32.xlu0 %v1841_v44, %s1648_s16  ;;  %1081 = vrot.lane.b32.xlu1 %v1819_v36, %s1648_s16  ;;  %v684_v60 = vpop.permute.xlu1 %683  ;;  %v692_v17 = vpop.permute.xlu2 %691 }
 0x143   : > { %v698_v19 = vsel %vm695_vm3, %v684_v60, %v692_v17  ;;  %v702_v58 = vsel %vm695_vm3, %v692_v17, %v684_v60  ;;  %v1144_v60 = vld [vmem:[%s2516_s4 + $0x8] sm:$0xff] }
 0x144   : > { %v866_v18 = vpop.permute.xlu0 %865 }
 0x145   : > { %v2109_v22 = vsel %vm871_vm5, %v858_v9, %v866_v18  ;;  %v2113_v49 = vsel %vm871_vm5, %v866_v18, %v858_v9 }
 0x148   : > { %933 = vrot.lane.b32.xlu2 %v1893_v63, %s1642_s19 }
 0x14a   : > { %1112 = vperm.xlu0 %1603, %v1773_v14   ;;  %1040 = vperm.xlu1 %1600, %v1773_v14   ;;  %v756_v37 = vpop.permute.xlu1 %755  ;;  %v764_v61 = vpop.permute.xlu2 %763 }
 0x14b   : > { %v770_v26 = vsel %vm767_vm4, %v756_v37, %v764_v61  ;;  %v774_v40 = vsel %vm767_vm4, %v764_v61, %v756_v37 }
 0x14c   : > { %v930_v25 = vpop.permute.xlu0 %929  ;;  %v788_v41 = vmul.f32 %v1999_v6, %v770_v26 }
 0x14d   : > { %v2125_v9 = vsel %vm943_vm6, %v930_v25, %v938_v39  ;;  %v2129_v53 = vsel %vm943_vm6, %v938_v39, %v930_v25 }
 0x14e   : > { %v812_v26 = vmul.f32 %v1903_v3, %v788_v41 }
 0x150   : > { %1003 = vrot.lane.b32.xlu2 %v1861_v51, %s1647_s13 }
 0x152   : > { %1120 = vperm.xlu0 %1603, %v1760_v12   ;;  %1013 = vrot.lane.b32.xlu1 %v1907_v7, %s1647_s13  ;;  %v868_v14 = vpop.permute.xlu1 %867  ;;  %v860_v42 = vpop.permute.xlu2 %859 }
 0x153   : > { %v2138_v46 = vsel %vm871_vm5, %v860_v42, %v868_v14  ;;  %v2142_v55 = vsel %vm871_vm5, %v868_v14, %v860_v42  ;;  %1602 = vset.pattern.permute.xlu1 %v1646_v23 }
 0x154   : > { %v543_v43 = vpop.permute.xlu0 %542 }
 0x155   : > { %v559_v39 = vsel %vm556_vm1, %v543_v43, %v2058_v31  ;;  %v563_v57 = vsel %vm556_vm1, %v2058_v31, %v543_v43  ;;  %v715_v43 = vmul.f32 %v1965_v34, %v702_v58 }
 0x156   : > { %v575_v18 = vmul.f32 %v1947_v27, %v563_v57  ;;  %v576_v37 = vmul.f32 %v1949_v30, %v559_v39 }
 0x158   : > { %1073 = vrot.lane.b32.xlu2 %v1827_v38, %s1648_s16 }
 0x15a   : > { %1606 = vset.pattern.permute.xlu0 %v2525_v2  ;;  %980 = vperm.xlu1 %1602, %v1781_v16   ;;  %v545_v23 = vpop.permute.xlu1 %544  ;;  %v553_v17 = vpop.permute.xlu2 %552  ;;  %v787_v2 = vmul.f32 %v1997_v56, %v774_v40 }
 0x15b   : > { %1154 = vperm.xlu0 %1606, %v1144_v60   ;;  %v560_v31 = vsel %vm556_vm1, %v545_v23, %v553_v17  ;;  %v564_v25 = vsel %vm556_vm1, %v553_v17, %v545_v23  ;;  %v716_v60 = vmul.f32 %v1967_v35, %v698_v19  ;;  %v603_v23 = vmul.f32 %v1849_v45, %v575_v18 }
 0x15c   : > { %v612_v61 = vpop.permute.xlu0 %611  ;;  %v604_v17 = vmul.f32 %v1849_v45, %v576_v37  ;;  %v739_v19 = vmul.f32 %v1924_v15, %v715_v43  ;;  %v811_v40 = vmul.f32 %v1903_v3, %v787_v2  ;;  %v577_v18 = vmul.f32 %v1947_v27, %v564_v25 }
 0x15d   : > { %v626_v14 = vsel %vm623_vm2, %v612_v61, %v620_v47  ;;  %v630_v42 = vsel %vm623_vm2, %v620_v47, %v612_v61  ;;  %v740_v58 = vmul.f32 %v1924_v15, %v716_v60  ;;  %v578_v45 = vmul.f32 %v1949_v30, %v560_v31 }
 0x15e   : > { %v643_v57 = vmul.f32 %v1957_v32, %v630_v42  ;;  %v644_v39 = vmul.f32 %v1959_v33, %v626_v14  ;;  %v2529_v37 = vmov 8   ;;  %v605_v31 = vmul.f32 %v1895_v0, %v577_v18  ;;  %v1531_v18 = vld [vmem:[%s2517_s5 + $0xa] sm:$0x3] }
 0x15f   : > { %v606_v25 = vmul.f32 %v1895_v0, %v578_v45 }
 0x160   : > { %v667_v52 = vmul.f32 %v1859_v50, %v643_v57  ;;  %v668_v47 = vmul.f32 %v1859_v50, %v644_v39  ;;  %908 = vperm.xlu2 %1595, %v1781_v16  }
 0x162   : > { %v675_v61 = vadd.f32 %v667_v52, %v603_v23  ;;  %v676_v14 = vadd.f32 %v668_v47, %v604_v17  ;;  %1604 = vset.pattern.permute.xlu1 %v2529_v37  ;;  %v614_v42 = vpop.permute.xlu1 %613  ;;  %v622_v50 = vpop.permute.xlu2 %621  ;;  %v2530_v47 = vmov 7  }
 0x163   : > { %v627_v43 = vsel %vm623_vm2, %v614_v42, %v622_v50  ;;  %v631_v15 = vsel %vm623_vm2, %v622_v50, %v614_v42  ;;  %1116 = vperm.xlu1 %1604, %v1768_v13  }
 0x164   : > { %v694_v57 = vpop.permute.xlu0 %693  ;;  %v747_v2 = vadd.f32 %v739_v19, %v675_v61  ;;  %v748_v52 = vadd.f32 %v740_v58, %v676_v14  ;;  %v645_v3 = vmul.f32 %v1957_v32, %v631_v15  ;;  %v646_v27 = vmul.f32 %v1959_v33, %v627_v43 }
 0x165   : > { %v2223_v15 = vperm.slane %v1531_v18, 0 }
 0x166   : > { %v819_v30 = vadd.f32 %v811_v40, %v747_v2  ;;  %v820_v41 = vadd.f32 %v812_v26, %v748_v52  ;;  %v669_v60 = vmul.f32 %v1879_v54, %v645_v3  ;;  %v670_v39 = vmul.f32 %v1879_v54, %v646_v27 }
 0x167   : > { %v2225_v2 = vperm.slane %v1531_v18, 1 }
 0x168   : > { %v677_v23 = vadd.f32 %v669_v60, %v605_v31  ;;  %v678_v17 = vadd.f32 %v670_v39, %v606_v25  ;;  %1601 = vset.pattern.permute.xlu2 %v2530_v47  ;;  %v839_v25 = vmul.f32 %v1939_v24, %v1803_v28  ;;  %v842_v28 = vmul.f32 %v1936_v21, %v1819_v36 }
 0x169   : > { %1044 = vperm.xlu2 %1601, %v1768_v13   ;;  %v888_v60 = vmul.f32 %v2225_v2, %v2026_v59  ;;  %v2531_v47 = vmov 0  }
 0x16a   : > { %v758_v19 = vpop.permute.xlu1 %757  ;;  %v686_v32 = vpop.permute.xlu2 %685  ;;  %v850_v36 = vadd.f32 %v842_v28, %v2097_v1 }
 0x16b   : > { %v699_v33 = vsel %vm695_vm3, %v686_v32, %v694_v57  ;;  %v703_v61 = vsel %vm695_vm3, %v694_v57, %v686_v32  ;;  %1085 = vrot.lane.b32.xlu1 %v1907_v7, %s1648_s16 }
 0x16c   : > { %v805_v58 = vpop.permute.xlu0 %804  ;;  %v717_v54 = vmul.f32 %v1965_v34, %v703_v61  ;;  %v718_v0 = vmul.f32 %v1967_v35, %v699_v33 }
 0x16e   : > { %v741_v14 = vmul.f32 %v1917_v11, %v717_v54  ;;  %v742_v13 = vmul.f32 %v1917_v11, %v718_v0 }
 0x170   : > { %v749_v40 = vadd.f32 %v741_v14, %v677_v23  ;;  %v750_v26 = vadd.f32 %v742_v13, %v678_v17 }
 0x171   : > { %1075 = vrot.lane.b32.xlu2 %v1861_v51, %s1648_s16 }
 0x172   : > { %v833_v45 = vpop.permute.xlu1 %832  ;;  %v766_v37 = vpop.permute.xlu2 %765 }
 0x173   : > { %v843_v42 = vmul.f32 %v833_v45, %v1861_v51  ;;  %v844_v34 = vmul.f32 %v833_v45, %v1841_v44  ;;  %v771_v50 = vsel %vm767_vm4, %v758_v19, %v766_v37  ;;  %v775_v11 = vsel %vm767_vm4, %v766_v37, %v758_v19  ;;  %1124 = vperm.xlu1 %1604, %v1781_v16  }
 0x174   : > { %v870_v35 = vpop.permute.xlu0 %869  ;;  %v789_v57 = vmul.f32 %v1997_v56, %v775_v11  ;;  %v790_v43 = vmul.f32 %v1999_v6, %v771_v50  ;;  %v840_v56 = vmul.f32 %v1939_v24, %v1805_v29  ;;  %v887_v6 = vmul.f32 %v2223_v15, %v2022_v5 }
 0x175   : > { %v2227_v51 = vadd.f32 %v843_v42, %v819_v30  ;;  %v2229_v44 = vadd.f32 %v844_v34, %v820_v41  ;;  %v1145_v30 = vld [vmem:[%s2516_s4 + $0x10] sm:$0xff]  ;;  %v841_v41 = vmul.f32 %v1936_v21, %v1827_v38  ;;  %v889_v29 = vmul.f32 %v2223_v15, %v2109_v22 }
 0x176   : > { %v813_v52 = vmul.f32 %v805_v58, %v789_v57  ;;  %v814_v3 = vmul.f32 %v805_v58, %v790_v43  ;;  %v890_v24 = vmul.f32 %v2225_v2, %v2113_v49  ;;  %v848_v39 = vadd.f32 %v840_v56, %v2014_v20  ;;  %v1532_v20 = vld [vmem:[%s2517_s5 + $0xc] sm:$0x3] }
 0x177   : > { %v849_v19 = vadd.f32 %v841_v41, %v2095_v62  ;;  %v2271_v0 = vperm.slane %v1532_v20, 0  ;;  %v2273_v14 = vperm.slane %v1532_v20, 1  ;;  %v892_v41 = vmul.f32 %v2225_v2, %v2142_v55 }
 0x178   : > { %v821_v27 = vadd.f32 %v813_v52, %v749_v40  ;;  %v822_v31 = vadd.f32 %v814_v3, %v750_v26 }
 0x179   : > { %1048 = vperm.xlu2 %1601, %v1760_v12   ;;  %v847_v12 = vadd.f32 %v839_v25, %v2012_v48  ;;  %v959_v13 = vmul.f32 %v2271_v0, %v2035_v4  ;;  %v960_v40 = vmul.f32 %v2273_v14, %v2039_v8  ;;  %v1143_v4 = vld [vmem:[%s2516_s4] sm:$0xff] }
 0x17a   : > { %v897_v5 = vpop.permute.xlu2 %896 }
 0x17b   : > { %v911_v23 = vmul.f32 %v897_v5, %v887_v6  ;;  %v912_v17 = vmul.f32 %v897_v5, %v888_v60  ;;  %1607 = vset.pattern.permute.xlu1 %v2531_v47  ;;  %v901_v38 = vpop.permute.xlu1 %900  ;;  %v1146_v60 = vld [vmem:[%s2516_s4 + $0x18] sm:$0xff] }
 0x17c   : > { %v1000_v59 = vpop.permute.xlu0 %999  ;;  %v913_v21 = vmul.f32 %v901_v38, %v889_v29  ;;  %v914_v22 = vmul.f32 %v901_v38, %v890_v24  ;;  %1159 = vperm.xlu1 %1607, %v1145_v30   ;;  %v891_v30 = vmul.f32 %v2223_v15, %v2138_v46  ;;  %v961_v29 = vmul.f32 %v2271_v0, %v2125_v9 }
 0x17d   : > { %v919_v32 = vadd.f32 %v911_v23, %v847_v12  ;;  %v920_v49 = vadd.f32 %v912_v17, %v848_v39 }
 0x17e   : > { %v921_v58 = vadd.f32 %v913_v21, %v849_v19  ;;  %v922_v33 = vadd.f32 %v914_v22, %v850_v36 }
 0x181   : > { %1077 = vrot.lane.b32.xlu2 %v1893_v63, %s1648_s16 }
 0x182   : > { %v862_v48 = vpop.permute.xlu2 %861 }
 0x183   : > { %v2265_v62 = vsel %vm871_vm5, %v862_v48, %v870_v35  ;;  %v2269_v1 = vsel %vm871_vm5, %v870_v35, %v862_v48  ;;  %v932_v54 = vpop.permute.xlu1 %931  ;;  %v1533_v48 = vld [vmem:[%s2517_s5 + $0xe] sm:$0x3] }
 0x184   : > { %v2261_v61 = vpop.permute.xlu0 %1009  ;;  %v893_v20 = vmul.f32 %v2223_v15, %v2265_v62 }
 0x189   : > { %1052 = vperm.xlu2 %1601, %v1781_v16  }
 0x18a   : > { %v940_v26 = vpop.permute.xlu2 %939 }
 0x18b   : > { %v946_v45 = vsel %vm943_vm6, %v932_v54, %v940_v26  ;;  %v950_v37 = vsel %vm943_vm6, %v940_v26, %v932_v54  ;;  %v2284_v42 = vpop.permute.xlu1 %1001  ;;  %v894_v54 = vmul.f32 %v2225_v2, %v2269_v1 }
 0x18c   : > { %v969_v18 = vpop.permute.xlu0 %968  ;;  %v963_v23 = vmul.f32 %v2271_v0, %v946_v45  ;;  %v964_v9 = vmul.f32 %v2273_v14, %v950_v37  ;;  %v1017_v2 = vsel %vm1015_vm7, %v2284_v42, %v2261_v61  ;;  %v1021_v1 = vsel %vm1015_vm7, %v2261_v61, %v2284_v42 }
 0x18d   : > { %v983_v34 = vmul.f32 %v969_v18, %v959_v13  ;;  %v984_v35 = vmul.f32 %v969_v18, %v960_v40  ;;  %v2335_v13 = vperm.slane %v1533_v48, 0  ;;  %v2337_v40 = vperm.slane %v1533_v48, 1 }
 0x18f   : > { %v2286_v50 = vadd.f32 %v983_v34, %v919_v32  ;;  %v2288_v16 = vadd.f32 %v984_v35, %v920_v49 }
 0x191   : > { %1605 = vset.pattern.permute.xlu2 %v2531_v47 }
 0x192   : > { %1149 = vperm.xlu2 %1605, %v1143_v4   ;;  %v1008_v8 = vpop.permute.xlu2 %1007 }
 0x193   : > { %v1016_v57 = vsel %vm1015_vm7, %v1000_v59, %v1008_v8  ;;  %v1020_v43 = vsel %vm1015_vm7, %v1008_v8, %v1000_v59  ;;  %v837_v52 = vpop.permute.xlu1 %836 }
 0x194   : > { %v2295_v11 = vpop.permute.xlu0 %1011  ;;  %v845_v3 = vmul.f32 %v837_v52, %v1893_v63  ;;  %v846_v25 = vmul.f32 %v837_v52, %v1907_v7  ;;  %v962_v63 = vmul.f32 %v2273_v14, %v2129_v53  ;;  %v1031_v18 = vmul.f32 %v2335_v13, %v1016_v57 }
 0x195   : > { %v1032_v45 = vmul.f32 %v2337_v40, %v1020_v43 }
 0x196   : > { %v853_v56 = vadd.f32 %v845_v3, %v821_v27  ;;  %v854_v6 = vadd.f32 %v846_v25, %v822_v31  ;;  %v1033_v3 = vmul.f32 %v2335_v13, %v1017_v2  ;;  %v1034_v25 = vmul.f32 %v2337_v40, %v1021_v1 }
 0x19a   : > { %1164 = vperm.xlu2 %1605, %v1146_v60   ;;  %v905_v28 = vpop.permute.xlu2 %904 }
 0x19b   : > { %v915_v27 = vmul.f32 %v905_v28, %v891_v30  ;;  %v916_v31 = vmul.f32 %v905_v28, %v892_v41 }
 0x19c   : > { %v2314_v7 = vpop.permute.xlu0 %1079  ;;  %v973_v24 = vpop.permute.xlu1 %972 }
 0x19d   : > { %v923_v5 = vadd.f32 %v915_v27, %v2227_v51  ;;  %v924_v46 = vadd.f32 %v916_v31, %v2229_v44  ;;  %v985_v59 = vmul.f32 %v973_v24, %v961_v29  ;;  %v986_v12 = vmul.f32 %v973_v24, %v962_v63 }
 0x19f   : > { %v993_v55 = vadd.f32 %v985_v59, %v921_v58  ;;  %v994_v39 = vadd.f32 %v986_v12, %v922_v33 }
 0x1a2   : > { %v934_v17 = vpop.permute.xlu2 %933 }
 0x1a4   : > { %v977_v47 = vpop.permute.xlu0 %976  ;;  %v942_v19 = vpop.permute.xlu1 %941 }
 0x1a5   : > { %v987_v53 = vmul.f32 %v977_v47, %v963_v23  ;;  %v988_v38 = vmul.f32 %v977_v47, %v964_v9  ;;  %v947_v36 = vsel %vm943_vm6, %v934_v17, %v942_v19  ;;  %v951_v51 = vsel %vm943_vm6, %v942_v19, %v934_v17 }
 0x1a6   : > { %v965_v63 = vmul.f32 %v2271_v0, %v947_v36  ;;  %v966_v61 = vmul.f32 %v2273_v14, %v951_v51 }
 0x1a7   : > { %v995_v44 = vadd.f32 %v987_v53, %v923_v5  ;;  %v996_v21 = vadd.f32 %v988_v38, %v924_v46  ;;  %v1534_v5 = vld [vmem:[%s2517_s5 + $0x10] sm:$0x3] }
 0x1a8   : > { %v1100_v23 = vperm.slane %v1534_v5, 1 }
 0x1aa   : > { %v1004_v22 = vpop.permute.xlu2 %1003 }
 0x1ab   : > { %v1018_v31 = vsel %vm1015_vm7, %v1004_v22, %v2295_v11  ;;  %v1022_v24 = vsel %vm1015_vm7, %v2295_v11, %v1004_v22 }
 0x1ac   : > { %v2324_v32 = vpop.permute.xlu1 %1071  ;;  %v2326_v58 = vpop.permute.xlu0 %1005  ;;  %v1036_v11 = vmul.f32 %v2337_v40, %v1022_v24 }
 0x1b2   : > { %v1074_v49 = vpop.permute.xlu2 %1073 }
 0x1b4   : > { %v1082_v33 = vpop.permute.xlu1 %1081  ;;  %v2341_v4 = vpop.permute.xlu0 %1083 }
 0x1b5   : > { %v1089_v59 = vsel %vm1087_vm8, %v1074_v49, %v1082_v33  ;;  %v1093_v12 = vsel %vm1087_vm8, %v1082_v33, %v1074_v49 }
 0x1b6   : > { %v1106_v47 = vmul.f32 %v1100_v23, %v1093_v12 }
 0x1ba   : > { %v909_v26 = vpop.permute.xlu2 %908 }
 0x1bb   : > { %v917_v37 = vmul.f32 %v909_v26, %v893_v20  ;;  %v918_v34 = vmul.f32 %v909_v26, %v894_v54 }
 0x1bc   : > { %v1041_v35 = vpop.permute.xlu1 %1040  ;;  %v1113_v29 = vpop.permute.xlu0 %1112 }
 0x1bd   : > { %v925_v8 = vadd.f32 %v917_v37, %v853_v56  ;;  %v926_v52 = vadd.f32 %v918_v34, %v854_v6  ;;  %v1055_v15 = vmul.f32 %v1041_v35, %v1031_v18  ;;  %v1056_v62 = vmul.f32 %v1041_v35, %v1032_v45 }
 0x1bf   : > { %v2352_v57 = vadd.f32 %v1055_v15, %v2286_v50  ;;  %v2355_v43 = vadd.f32 %v1056_v62, %v2288_v16  ;;  %v1092_v15 = vsel %vm1087_vm8, %v2314_v7, %v2324_v32 }
 0x1c3   : > { %v1045_v56 = vpop.permute.xlu2 %1044 }
 0x1c4   : > { %v1057_v6 = vmul.f32 %v1045_v56, %v1033_v3  ;;  %v1058_v60 = vmul.f32 %v1045_v56, %v1034_v25  ;;  %v1014_v30 = vpop.permute.xlu1 %1013  ;;  %v1121_v14 = vpop.permute.xlu0 %1120 }
 0x1c5   : > { %v1019_v1 = vsel %vm1015_vm7, %v2326_v58, %v1014_v30  ;;  %v1023_v3 = vsel %vm1015_vm7, %v1014_v30, %v2326_v58 }
 0x1c6   : > { %v1065_v41 = vadd.f32 %v1057_v6, %v993_v55  ;;  %v1066_v28 = vadd.f32 %v1058_v60, %v994_v39  ;;  %v1035_v55 = vmul.f32 %v2335_v13, %v1018_v31  ;;  %v1099_v39 = vperm.slane %v1534_v5, 0 }
 0x1c7   : > { %v1104_v6 = vmul.f32 %v1100_v23, %v1092_v15  ;;  %v1037_v60 = vmul.f32 %v2335_v13, %v1019_v1  ;;  %v1215_v1 = vld [vmem:[%s2518_s6 + $0x8] sm:$0xff] }
 0x1c8   : > { %v1105_v17 = vmul.f32 %v1099_v39, %v1089_v59 }
 0x1cb   : > { %v1076_v42 = vpop.permute.xlu2 %1075 }
 0x1cc   : > { %v981_v50 = vpop.permute.xlu1 %980  ;;  %v1090_v62 = vsel %vm1087_vm8, %v1076_v42, %v2341_v4  ;;  %v1094_v2 = vsel %vm1087_vm8, %v2341_v4, %v1076_v42 }
 0x1cd   : > { %v989_v27 = vmul.f32 %v981_v50, %v965_v63  ;;  %v990_v16 = vmul.f32 %v981_v50, %v966_v61  ;;  %v1155_v20 = vpop.permute.xlu0 %1154  ;;  %v1128_v63 = vmul.f32 %v1113_v29, %v1104_v6  ;;  %v1216_v6 = vld [vmem:[%s2518_s6 + $0x10] sm:$0xff] }
 0x1cf   : > { %v2370_v46 = vadd.f32 %v989_v27, %v925_v8  ;;  %v2372_v0 = vadd.f32 %v990_v16, %v926_v52  ;;  %v1136_v16 = vadd.f32 %v1128_v63, %v2355_v43 }
 0x1d3   : > { %v1049_v9 = vpop.permute.xlu2 %1048 }
 0x1d4   : > { %v1059_v53 = vmul.f32 %v1049_v9, %v1035_v55  ;;  %v1060_v38 = vmul.f32 %v1049_v9, %v1036_v11 }
 0x1d5   : > { %v1117_v19 = vpop.permute.xlu1 %1116 }
 0x1d6   : > { %v1067_v36 = vadd.f32 %v1059_v53, %v995_v44  ;;  %v1068_v51 = vadd.f32 %v1060_v38, %v996_v21  ;;  %v1129_v22 = vmul.f32 %v1117_v19, %v1105_v17  ;;  %v1130_v48 = vmul.f32 %v1117_v19, %v1106_v47 }
 0x1d7   : > { %v1088_v21 = vsel %vm1087_vm8, %v2324_v32, %v2314_v7  ;;  %v1107_v7 = vmul.f32 %v1099_v39, %v1090_v62  ;;  %v1108_v32 = vmul.f32 %v1100_v23, %v1094_v2 }
 0x1d8   : > { %v1137_v54 = vadd.f32 %v1129_v22, %v1065_v41  ;;  %v1138_v26 = vadd.f32 %v1130_v48, %v1066_v28  ;;  %v1103_v56 = vmul.f32 %v1099_v39, %v1088_v21  ;;  %v1038_v41 = vmul.f32 %v2337_v40, %v1023_v3  ;;  %v1214_v3 = vld [vmem:[%s2518_s6] sm:$0xff] }
 0x1d9   : > { %v1131_v58 = vmul.f32 %v1121_v14, %v1107_v7  ;;  %v1132_v30 = vmul.f32 %v1121_v14, %v1108_v32 }
 0x1da   : > { %v1169_v49 = vadd.f32 %v1155_v20, %v1137_v54  ;;  %v1170_v33 = vadd.f32 %v1155_v20, %v1138_v26  ;;  %v1127_v28 = vmul.f32 %v1113_v29, %v1103_v56 }
 0x1db   : > { %v1078_v18 = vpop.permute.xlu2 %1077  ;;  %v1139_v29 = vadd.f32 %v1131_v58, %v1067_v36  ;;  %v1140_v59 = vadd.f32 %v1132_v30, %v1068_v51 }
 0x1dc   : > { %v1177_v45 = vmax.f32 %v1169_v49, 0.0  ;;  %v1178_v37 = vmax.f32 %v1170_v33, 0.0  ;;  %v1135_v27 = vadd.f32 %v1127_v28, %v2352_v57 }
 0x1dd   : > { %v1086_v34 = vpop.permute.xlu1 %1085 }
 0x1de   : > { %v2381_v35 = vmin.f32 %v1177_v45, 6.0  ;;  %v2383_v8 = vmin.f32 %v1178_v37, 6.0  ;;  %v1091_v4 = vsel %vm1087_vm8, %v1078_v18, %v1086_v34  ;;  %v1095_v61 = vsel %vm1087_vm8, %v1086_v34, %v1078_v18 }
 0x1df   : > { %v1109_v31 = vmul.f32 %v1099_v39, %v1091_v4  ;;  %v1110_v13 = vmul.f32 %v1100_v23, %v1095_v61  ;;  %v1651_v45 = vmov 256.0  }
 0x1e0   : > { %v1194_v52 = vadd.f32 %v2383_v8, %v2381_v35  ;;  %1608 = vrcp.f32 %v1651_v45 }
 0x1e2   : > { %1195 = vadd.xlane.f32.xlu2 %v1194_v52 }
 0x1e3   : > { %v1053_v44 = vpop.permute.xlu2 %1052 }
 0x1e4   : > { %v1061_v42 = vmul.f32 %v1053_v44, %v1037_v60  ;;  %v1062_v50 = vmul.f32 %v1053_v44, %v1038_v41 }
 0x1e5   : > { %v1125_v25 = vpop.permute.xlu1 %1124 }
 0x1e6   : > { %v1069_v12 = vadd.f32 %v1061_v42, %v2370_v46  ;;  %v1070_v10 = vadd.f32 %v1062_v50, %v2372_v0  ;;  %v1133_v55 = vmul.f32 %v1125_v25, %v1109_v31  ;;  %v1134_v11 = vmul.f32 %v1125_v25, %v1110_v13  ;;  %v1609_v37 = vpop.eup %1608  ;;  %v1217_v42 = vld [vmem:[%s2518_s6 + $0x18] sm:$0xff] }
 0x1e7   : > { %v1204_v34 = vmul.f32 256.0, %v1609_v37  ;;  %vm1208_vm9 = vweird.f32 %v1609_v37 }
 0x1e8   : > { %v1141_v38 = vadd.f32 %v1133_v55, %v1069_v12  ;;  %v1142_v46 = vadd.f32 %v1134_v11, %v1070_v10  ;;  %v1236_v12 = vld [vmem:[%s2519_s7] sm:$0x1] }
 0x1e9   : > { %v1205_v52 = vsub.f32 1.0, %v1204_v34 }
 0x1eb   : > { %v1206_v44 = vmul.f32 %v1609_v37, %v1205_v52 }
 0x1ec   : > { %v1150_v24 = vpop.permute.xlu2 %1149 }
 0x1ed   : > { %v1167_v40 = vadd.f32 %v1150_v24, %v1135_v27  ;;  %v1168_v5 = vadd.f32 %v1150_v24, %v1136_v16  ;;  %v1207_v21 = vadd.f32 %v1609_v37, %v1206_v44 }
 0x1ee   : > { %v1160_v9 = vpop.permute.xlu1 %1159 }
 0x1ef   : > { %v1175_v17 = vmax.f32 %v1167_v40, 0.0  ;;  %v1176_v14 = vmax.f32 %v1168_v5, 0.0  ;;  %v1171_v47 = vadd.f32 %v1160_v9, %v1139_v29  ;;  %v1172_v57 = vadd.f32 %v1160_v9, %v1140_v59  ;;  %v1242_v9 = vld [vmem:[%s2520_s8 + $0x18] sm:$0xff] }
 0x1f0   : > { %v1209_v15 = vsel %vm1208_vm9, %v1609_v37, %v1207_v21 }
 0x1f1   : > { %v2417_v53 = vmin.f32 %v1175_v17, 6.0  ;;  %v2419_v43 = vmin.f32 %v1176_v14, 6.0  ;;  %v1179_v39 = vmax.f32 %v1171_v47, 0.0  ;;  %v1180_v23 = vmax.f32 %v1172_v57, 0.0  ;;  %v1241_v17 = vld [vmem:[%s2520_s8 + $0x10] sm:$0xff]  ;;  %v1239_v14 = vld [vmem:[%s2520_s8] sm:$0xff] }
 0x1f3   : > { %v2421_v19 = vmin.f32 %v1179_v39, 6.0  ;;  %v2423_v36 = vmin.f32 %v1180_v23, 6.0  ;;  %v1191_v0 = vadd.f32 %v2419_v43, %v2417_v53 }
 0x1f4   : > { %v1165_v51 = vpop.permute.xlu2 %1164 }
 0x1f5   : > { %v1173_v22 = vadd.f32 %v1165_v51, %v1141_v38  ;;  %v1174_v48 = vadd.f32 %v1165_v51, %v1142_v46  ;;  %1192 = vadd.xlane.f32.xlu1 %v1191_v0  ;;  %v1197_v20 = vadd.f32 %v2423_v36, %v2421_v19  ;;  %v1240_v51 = vld [vmem:[%s2520_s8 + $0x8] sm:$0xff] }
 0x1f7   : > { %v1181_v54 = vmax.f32 %v1173_v22, 0.0  ;;  %v1182_v26 = vmax.f32 %v1174_v48, 0.0  ;;  %1198 = vadd.xlane.f32.xlu0 %v1197_v20  ;;  %v1263_v20 = vld [vmem:[%s2521_s9 + $0x18] sm:$0xff] }
 0x1f9   : > { %v2429_v49 = vmin.f32 %v1181_v54, 6.0  ;;  %v2431_v33 = vmin.f32 %v1182_v26, 6.0  ;;  %v1262_v54 = vld [vmem:[%s2521_s9 + $0x10] sm:$0xff]  ;;  %v1260_v26 = vld [vmem:[%s2521_s9] sm:$0xff] }
 0x1fb   : > { %v1200_v18 = vadd.f32 %v2431_v33, %v2429_v49 }
 0x1fd   : > { %1201 = vadd.xlane.f32.xlu2 %v1200_v18 }
 0x255   : > { %v1196_v62 = vpop.xlane.xlu2 %1195 }
 0x256   : > { %v1211_v2 = vmul.f32 %v1209_v15, %v1196_v62 }
 0x258   : > { %v1219_v32 = vmul.f32 %v1215_v1, %v1211_v2  ;;  %v1261_v2 = vld [vmem:[%s2521_s9 + $0x8] sm:$0xff] }
 0x25a   : > { %v1224_v4 = vsel %vm1222_vm10, %v1219_v32, 0.0 }
 0x268   : > { %v1193_v25 = vpop.xlane.xlu1 %1192 }
 0x269   : > { %v1210_v56 = vmul.f32 %v1209_v15, %v1193_v25 }
 0x26a   : > { %v1199_v7 = vpop.xlane.xlu0 %1198 }
 0x26b   : > { %v1218_v60 = vmul.f32 %v1214_v3, %v1210_v56  ;;  %v1212_v41 = vmul.f32 %v1209_v15, %v1199_v7 }
 0x26d   : > { %v1223_v28 = vsel %vm1222_vm10, %v1218_v60, 0.0  ;;  %v1220_v63 = vmul.f32 %v1216_v6, %v1212_v41 }
 0x26e   : > { %v1225_v61 = vadd.f32 %v1224_v4, %v1223_v28 }
 0x26f   : > { %v1226_v58 = vsel %vm1222_vm10, %v1220_v63, 0.0 }
 0x270   : > { %v1202_v50 = vpop.xlane.xlu2 %1201  ;;  %v1227_v16 = vadd.f32 %v1226_v58, %v1225_v61 }
 0x271   : > { %v1213_v30 = vmul.f32 %v1209_v15, %v1202_v50 }
 0x273   : > { %v1221_v27 = vmul.f32 %v1217_v42, %v1213_v30 }
 0x275   : > { %v1228_v31 = vsel %vm1222_vm10, %v1221_v27, 0.0 }
 0x276   : > { %v1229_v13 = vadd.f32 %v1228_v31, %v1227_v16 }
 0x278   : > { %v1230_v24 = vrot.slane %v1229_v13, 4 }
 0x27a   : > { %v1231_v40 = vadd.f32 %v1230_v24, %v1229_v13 }
 0x27c   : > { %v1232_v5 = vrot.slane %v1231_v40, 2 }
 0x27e   : > { %v1233_v29 = vadd.f32 %v1232_v5, %v1231_v40 }
 0x280   : > { %v1234_v59 = vrot.slane %v1233_v29, 1 }
 0x282   : > { %v1235_v10 = vadd.f32 %v1234_v59, %v1233_v29 }
 0x284   : > { %v1237_v55 = vadd.f32 %v1236_v12, %v1235_v10 }
 0x286   : > { %v1238_v11 = vmax.f32 %v1237_v55, 0.0 }
 0x288   : > { %v1243_v47 = vperm.slane %v1238_v11, 0 }
 0x28a   : > { %v1247_v57 = vmul.f32 %v1243_v47, %v1242_v9  ;;  %v1246_v39 = vmul.f32 %v1243_v47, %v1241_v17  ;;  %v1244_v23 = vmul.f32 %v1243_v47, %v1239_v14  ;;  %v1245_v22 = vmul.f32 %v1243_v47, %v1240_v51 }
 0x28c   : > { %v1257_v38 = vsel %vm1222_vm10, %v1247_v57, 0.0  ;;  %v1254_v46 = vsel %vm1222_vm10, %v1246_v39, 0.0  ;;  %v1248_v0 = vsel %vm1222_vm10, %v1244_v23, 0.0  ;;  %v1251_v48 = vsel %vm1222_vm10, %v1245_v22, 0.0 }
 0x28d   : > { %1258 = vadd.xlane.f32.xlu2 %v1257_v38  ;;  %1255 = vadd.xlane.f32.xlu1 %v1254_v46 }
 0x28e   : > { %1249 = vadd.xlane.f32.xlu0 %v1248_v0 }
 0x295   : > { %1252 = vadd.xlane.f32.xlu1 %v1251_v48 }
 0x300   : > { %v1259_v18 = vpop.xlane.xlu2 %1258  ;;  %v1256_v45 = vpop.xlane.xlu1 %1255 }
 0x301   : > { %v1267_v37 = vadd.f32 %v1263_v20, %v1259_v18  ;;  %v1266_v34 = vadd.f32 %v1262_v54, %v1256_v45  ;;  %v1250_v52 = vpop.xlane.xlu0 %1249 }
 0x302   : > { %v1264_v44 = vadd.f32 %v1260_v26, %v1250_v52 }
 0x303   : > { %v1538_v21 = vmul.f32 -1.442695, %v1267_v37  ;;  %v1537_v15 = vmul.f32 -1.442695, %v1266_v34  ;;  %v1378_v34 = vld [vmem:[%s2523_s11] sm:$0xff] }
 0x304   : > { %v1535_v62 = vmul.f32 -1.442695, %v1264_v44 }
 0x305   : > { %1610 = vpow2.f32 %v1538_v21  ;;  %v1379_v21 = vld [vmem:[%s2523_s11 + $0x8] sm:$0xff] }
 0x306   : > { %1612 = vpow2.f32 %v1537_v15 }
 0x307   : > { %1614 = vpow2.f32 %v1535_v62 }
 0x308   : > { %v1253_v1 = vpop.xlane.xlu1 %1252 }
 0x309   : > { %v1265_v3 = vadd.f32 %v1261_v2, %v1253_v1 }
 0x30b   : > { %v1611_v25 = vpop.eup %1610  ;;  %v1536_v56 = vmul.f32 -1.442695, %v1265_v3 }
 0x30c   : > { %v1613_v6 = vpop.eup %1612  ;;  %v1283_v7 = vadd.f32 1.0, %v1611_v25 }
 0x30d   : > { %v1615_v32 = vpop.eup %1614  ;;  %v1282_v60 = vadd.f32 1.0, %v1613_v6  ;;  %1616 = vpow2.f32 %v1536_v56 }
 0x30e   : > { %1618 = vrcp.f32 %v1283_v7  ;;  %v1280_v41 = vadd.f32 1.0, %v1615_v32  ;;  %vm1334_vm11 = vweird.f32 %v1283_v7  ;;  %v1338_v31 = vand.u32 2147483647, %v1283_v7 }
 0x30f   : > { %1620 = vrcp.f32 %v1282_v60  ;;  %vm1319_vm12 = vweird.f32 %v1282_v60  ;;  %v1340_v13 = vand.u32 2147483648, %v1283_v7  ;;  %v1325_v24 = vand.u32 2147483648, %v1282_v60 }
 0x310   : > { %1622 = vrcp.f32 %v1280_v41  ;;  %v1323_v59 = vand.u32 2147483647, %v1282_v60  ;;  %v1295_v12 = vand.u32 2147483648, %v1280_v41  ;;  %v1293_v11 = vand.u32 2147483647, %v1280_v41 }
 0x311   : > { %vm1339_vm1 = vcmp.eq.f32.partialorder %v1338_v31, 8.507059e+37  ;;  %v1341_v14 = vor.u32 1.1754944e-38, %v1340_v13  ;;  %vm1289_vm2 = vweird.f32 %v1280_v41  ;;  %v1326_v47 = vor.u32 1.1754944e-38, %v1325_v24 }
 0x312   : > { %vm1324_vm4 = vcmp.eq.f32.partialorder %v1323_v59, 8.507059e+37  ;;  %v1296_v0 = vor.u32 1.1754944e-38, %v1295_v12  ;;  %vm1294_vm6 = vcmp.eq.f32.partialorder %v1293_v11, 8.507059e+37 }
 0x313   : > { %v1617_v28 = vpop.eup %1616 }
 0x314   : > { %v1619_v63 = vpop.eup %1618  ;;  %v1281_v4 = vadd.f32 1.0, %v1617_v28 }
 0x315   : > { %v1621_v61 = vpop.eup %1620  ;;  %v1330_v42 = vmul.f32 %v1619_v63, %v1283_v7  ;;  %vm1335_vm13 = vweird.f32 %v1619_v63 }
 0x316   : > { %v1623_v50 = vpop.eup %1622  ;;  %1624 = vrcp.f32 %v1281_v4  ;;  %v1315_v58 = vmul.f32 %v1621_v61, %v1282_v60  ;;  %vm1320_vm14 = vweird.f32 %v1621_v61  ;;  %vm1336_vm0 = vmor %vm1334_vm11, %vm1335_vm13  ;;  %v1310_v54 = vand.u32 2147483648, %v1281_v4 }
 0x317   : > { %v1331_v30 = vsub.f32 1.0, %v1330_v42  ;;  %v1285_v27 = vmul.f32 %v1623_v50, %v1280_v41  ;;  %vm1290_vm15 = vweird.f32 %v1623_v50  ;;  %vm1321_vm3 = vmor %vm1319_vm12, %vm1320_vm14  ;;  %v1308_v18 = vand.u32 2147483647, %v1281_v4 }
 0x318   : > { %v1316_v16 = vsub.f32 1.0, %v1315_v58  ;;  %vm1291_vm5 = vmor %vm1289_vm2, %vm1290_vm15  ;;  %vm1304_vm8 = vweird.f32 %v1281_v4  ;;  %v1311_v37 = vor.u32 1.1754944e-38, %v1310_v54  ;;  %vm1395_vm11 = vcmask 261120  }
 0x319   : > { %v1332_v40 = vmul.f32 %v1619_v63, %v1331_v30  ;;  %v1286_v5 = vsub.f32 1.0, %v1285_v27  ;;  %vm1309_vm10 = vcmp.eq.f32.partialorder %v1308_v18, 8.507059e+37  ;;  %v428_v30 = vld [vmem:[%s1748_s17 + $0x8] sm:$0xff] }
 0x31a   : > { %v1317_v29 = vmul.f32 %v1621_v61, %v1316_v16  ;;  %v1429_v31 = vunpack.c.l.bf16 %v428_v30  ;;  %v1430_v13 = vunpack.c.h.bf16 %v428_v30 }
 0x31b   : > { %v1333_v10 = vadd.f32 %v1619_v63, %v1332_v40  ;;  %v1287_v55 = vmul.f32 %v1623_v50, %v1286_v5 }
 0x31c   : > { %v1625_v9 = vpop.eup %1624  ;;  %v1318_v17 = vadd.f32 %v1621_v61, %v1317_v29 }
 0x31d   : > { %v1337_v57 = vsel %vm1336_vm0, %v1619_v63, %v1333_v10  ;;  %v1288_v39 = vadd.f32 %v1623_v50, %v1287_v55  ;;  %v1300_v23 = vmul.f32 %v1625_v9, %v1281_v4  ;;  %vm1305_vm7 = vweird.f32 %v1625_v9 }
 0x31e   : > { %v1322_v38 = vsel %vm1321_vm3, %v1621_v61, %v1318_v17  ;;  %v1342_v46 = vsel %vm1339_vm1, %v1341_v14, %v1337_v57  ;;  %vm1306_vm9 = vmor %vm1304_vm8, %vm1305_vm7 }
 0x31f   : > { %v1327_v51 = vsel %vm1324_vm4, %v1326_v47, %v1322_v38  ;;  %1361 = vperm.xlu0 %1606, %v1342_v46   ;;  %v1292_v22 = vsel %vm1291_vm5, %v1623_v50, %v1288_v39  ;;  %v1301_v48 = vsub.f32 1.0, %v1300_v23 }
 0x320   : > { %1356 = vperm.xlu2 %1605, %v1327_v51   ;;  %v1297_v20 = vsel %vm1294_vm6, %v1296_v0, %v1292_v22 }
 0x321   : > { %1346 = vperm.xlu1 %1607, %v1297_v20   ;;  %v1302_v26 = vmul.f32 %v1625_v9, %v1301_v48 }
 0x323   : > { %v1303_v45 = vadd.f32 %v1625_v9, %v1302_v26 }
 0x325   : > { %v1307_v52 = vsel %vm1306_vm9, %v1625_v9, %v1303_v45 }
 0x326   : > { %v1312_v44 = vsel %vm1309_vm10, %v1311_v37, %v1307_v52 }
 0x327   : > { %1351 = vperm.xlu0 %1606, %v1312_v44  }
 0x328   : > { %1382 = vperm.xlu2 %1605, %v1378_v34  }
 0x329   : > { %1387 = vperm.xlu1 %1607, %v1379_v21  }
 0x37a   : > { %v1357_v15 = vpop.permute.xlu2 %1356 }
 0x37b   : > { %v1368_v2 = vmul.f32 %v1357_v15, %v2421_v19  ;;  %v1369_v1 = vmul.f32 %v1357_v15, %v2423_v36 }
 0x391   : > { %v1362_v62 = vpop.permute.xlu0 %1361 }
 0x392   : > { %v1370_v3 = vmul.f32 %v1362_v62, %v2429_v49  ;;  %v1371_v25 = vmul.f32 %v1362_v62, %v2431_v33  ;;  %v1553_v49 = vld [vmem:[%s2522_s10] sm:$0xff]  ;;  %v1383_v33 = vpop.permute.xlu2 %1382 }
 0x393   : > { %v1347_v7 = vpop.permute.xlu1 %1346 }
 0x394   : > { %v1374_v56 = vpack.c.bf16 %v1370_v3, %v1368_v2  ;;  %v1375_v6 = vpack.c.bf16 %v1371_v25, %v1369_v1  ;;  %v1364_v60 = vmul.f32 %v1347_v7, %v2417_v53  ;;  %v1365_v41 = vmul.f32 %v1347_v7, %v2419_v43  ;;  %v427_v53 = vld [vmem:[%s1748_s17] sm:$0xff] }
 0x395   : > { %v1427_v43 = vunpack.c.l.bf16 %v427_v53  ;;  %v1428_v4 = vunpack.c.h.bf16 %v427_v53 }
 0x396   : > { %1405 = vmatpush.bf16.msra.mxu2 %v1374_v56  ;;  %1419 = vmatpush.bf16.msra.mxu3 %v1375_v6 }
 0x399   : > { %v1352_v32 = vpop.permute.xlu0 %1351 }
 0x39a   : > { %v1366_v28 = vmul.f32 %v1352_v32, %v2381_v35  ;;  %v1367_v19 = vmul.f32 %v1352_v32, %v2383_v8 }
 0x39b   : > { %v1388_v16 = vpop.permute.xlu1 %1387 }
 0x39c   : > { %v1372_v36 = vpack.c.bf16 %v1366_v28, %v1364_v60  ;;  %v1373_v63 = vpack.c.bf16 %v1367_v19, %v1365_v41 }
 0x39e   : > { %1406 = vmatpush.bf16.msra.mxu2 %v1372_v36  ;;  %1420 = vmatpush.bf16.msra.mxu3 %v1373_v63 }
 0x3a1   : > { %1543 = vmatmul.msk.bf16.vlgmr.msra.gmra.mxu2 %vm1395_vm11, %v1553_v49  ;;  %1544 = vmatmul.msk.bf16.vlgmr.msra.gmra.mxu3 %vm1395_vm11, %v1553_v49 }
 0x424   : > { %v1408_v35 = vpop.f32.mrf.mxu2  ;;  %v1422_v61 = vpop.f32.mrf.mxu3 }
 0x425   : > { %v1409_v8 = vadd.f32 %v1408_v35, %v1383_v33  ;;  %v1423_v42 = vadd.f32 %v1422_v61, %v1383_v33 }
 0x427   : > { %v1431_v50 = vadd.f32 %v1427_v43, %v1409_v8  ;;  %v1432_v58 = vadd.f32 %v1428_v4, %v1423_v42 }
 0x429   : > { %v1435_v27 = vpack.c.bf16 %v1432_v58, %v1431_v50 }
 0x42b   : > { %1437 = vst [vmem:[%s420_s29] sm:$0xff] %v1435_v27 }
 0x42c   : > { %v1410_v24 = vpop.f32.mrf.mxu2  ;;  %v1424_v40 = vpop.f32.mrf.mxu3 }
 0x42d   : > { %v1411_v5 = vadd.f32 %v1410_v24, %v1388_v16  ;;  %v1425_v29 = vadd.f32 %v1424_v40, %v1388_v16 }
 0x42f   : > { %v1433_v59 = vadd.f32 %v1429_v31, %v1411_v5  ;;  %v1434_v12 = vadd.f32 %v1430_v13, %v1425_v29 }
 0x431   : > { %v1436_v10 = vpack.c.bf16 %v1434_v12, %v1433_v59 }
 0x433   : > { %1438 = vst [vmem:[%s420_s29 + $0x8] sm:$0xff] %v1436_v10 }
 0x434 PF: > { %s22_s21 = sadd.s32 1, %s1632_s21  }
 0x435   : > { %p19_p4 = scmp.ge.s32.totalorder %s22_s21, 4  }
 0x437   :  { %21 = sbr.rel (!%p19_p4) target bundleno = 1 (0x1), region = 105 }

</bundles_post_ra>
